<compile_context>
chip_gen: v7x
topology: tpu7x:2x2x1
jax: 0.10.0
libtpu: 0.0.40
codegen_flags: <defaults>
</compile_context>

<pallas_src>
import math

import jax
import jax.numpy as jnp
from jax.experimental import pallas as pl
from jax.experimental.pallas import tpu as pltpu

LANE = 128
_BN_EPS = 1e-5
_INV_SQRT2 = 1.0 / math.sqrt(2.0)
# VMEM cap (below physical VMEM on v5e/v6e/v7x); actual per-call usage with
# 512x512 bf16 adjacency tiles is only a few MiB.
_VMEM_LIMIT = 48 * 1024 * 1024


def _round_up(x, m):
    return ((x + m - 1) // m) * m


# ----------------------------- Pallas kernels ------------------------------ #

def _project_kernel(x_ref, w_ref, o_ref):
    # P = X @ W   (bf16 operands, f32 MXU accumulation, bf16 result).
    o_ref[...] = jnp.dot(
        x_ref[...], w_ref[...], preferred_element_type=jnp.float32
    ).astype(o_ref.dtype)


def _aggregate_kernel(a_ref, p_ref, h_ref, stats_ref, acc_ref):
    # H = A_hat @ P, tiled over (rows, contraction); the contraction axis is
    # last / "arbitrary"; acc_ref is a VMEM f32 accumulator resident across k.
    k = pl.program_id(1)

    @pl.when(k == 0)
    def _():
        acc_ref[...] = jnp.zeros_like(acc_ref)

    acc_ref[...] += jnp.dot(a_ref[...], p_ref[...],
                            preferred_element_type=jnp.float32)

    @pl.when(k == pl.num_programs(1) - 1)
    def _():
        h = acc_ref[...]
        h_ref[...] = h
        # Per-row-tile partial BatchNorm statistics (padded rows are zero and
        # do not perturb the sums; the mean divides by the true N outside).
        s = jnp.sum(h, axis=0, keepdims=True)
        ss = jnp.sum(h * h, axis=0, keepdims=True)
        pad = jnp.zeros((6, h.shape[1]), jnp.float32)
        stats_ref[...] = jnp.concatenate([s, ss, pad], axis=0)


def _bn_gelu_project_kernel(h_ref, scale_ref, shift_ref, w_ref, b_ref, o_ref):
    # Folded BatchNorm (single per-feature multiply-add) + exact-erf GELU in
    # f32 on the VPU/EUP, then the next projection on the MXU (bf16 in, f32
    # accumulate).
    h = h_ref[...]
    hn = h * scale_ref[...] + shift_ref[...]
    g = 0.5 * hn * (1.0 + jax.lax.erf(hn * _INV_SQRT2))
    o_ref[...] = (
        jnp.dot(g.astype(w_ref.dtype), w_ref[...],
                preferred_element_type=jnp.float32)
        + b_ref[...]
    ).astype(o_ref.dtype)


# ----------------------------- kernel wrappers ----------------------------- #

def _project(x_bf16, w_bf16, tm):
    n_pad, din_pad = x_bf16.shape
    dh_pad = w_bf16.shape[1]
    m_tiles = n_pad // tm
    return pl.pallas_call(
        _project_kernel,
        out_shape=jax.ShapeDtypeStruct((n_pad, dh_pad), jnp.bfloat16),
        grid_spec=pltpu.PrefetchScalarGridSpec(
            num_scalar_prefetch=0,
            grid=(m_tiles,),
            in_specs=[pl.BlockSpec((tm, din_pad), lambda i: (i, 0)),
                      pl.BlockSpec((din_pad, dh_pad), lambda i: (0, 0))],
            out_specs=pl.BlockSpec((tm, dh_pad), lambda i: (i, 0))),
        compiler_params=pltpu.CompilerParams(
            dimension_semantics=("parallel",),
            vmem_limit_bytes=_VMEM_LIMIT),
    )(x_bf16, w_bf16)


def _aggregate(a_bf16, p_bf16, tm, tk):
    n_pad = a_bf16.shape[0]
    dh_pad = p_bf16.shape[1]
    m_tiles = n_pad // tm
    k_tiles = n_pad // tk
    flops = 2 * n_pad * n_pad * dh_pad
    bytes_accessed = (a_bf16.size * 2 + p_bf16.size * 2 * m_tiles
                      + n_pad * dh_pad * 4 + m_tiles * 8 * dh_pad * 4)
    return pl.pallas_call(
        _aggregate_kernel,
        out_shape=(jax.ShapeDtypeStruct((n_pad, dh_pad), jnp.float32),
                   jax.ShapeDtypeStruct((m_tiles * 8, dh_pad), jnp.float32)),
        grid_spec=pltpu.PrefetchScalarGridSpec(
            num_scalar_prefetch=0,
            grid=(m_tiles, k_tiles),
            in_specs=[pl.BlockSpec((tm, tk), lambda i, k: (i, k)),
                      pl.BlockSpec((tk, dh_pad), lambda i, k: (k, 0))],
            out_specs=[pl.BlockSpec((tm, dh_pad), lambda i, k: (i, 0)),
                       pl.BlockSpec((8, dh_pad), lambda i, k: (i, 0))],
            scratch_shapes=[pltpu.VMEM((tm, dh_pad), jnp.float32)]),
        compiler_params=pltpu.CompilerParams(
            dimension_semantics=("parallel", "arbitrary"),
            vmem_limit_bytes=_VMEM_LIMIT),
        cost_estimate=pl.CostEstimate(flops=flops, transcendentals=0,
                                      bytes_accessed=bytes_accessed),
    )(a_bf16, p_bf16)


def _bn_gelu_project(h_f32, scale, shift, w_bf16, b_f32, tm, out_dtype):
    n_pad, dh_pad = h_f32.shape
    dout_pad = w_bf16.shape[1]
    m_tiles = n_pad // tm
    flops = 2 * n_pad * dh_pad * dout_pad + 4 * n_pad * dh_pad
    bytes_accessed = (h_f32.size * 4 + w_bf16.size * 2 * m_tiles
                      + n_pad * dout_pad * (4 if out_dtype == jnp.float32 else 2))
    return pl.pallas_call(
        _bn_gelu_project_kernel,
        out_shape=jax.ShapeDtypeStruct((n_pad, dout_pad), out_dtype),
        grid_spec=pltpu.PrefetchScalarGridSpec(
            num_scalar_prefetch=0,
            grid=(m_tiles,),
            in_specs=[pl.BlockSpec((tm, dh_pad), lambda i: (i, 0)),
                      pl.BlockSpec((1, dh_pad), lambda i: (0, 0)),
                      pl.BlockSpec((1, dh_pad), lambda i: (0, 0)),
                      pl.BlockSpec((dh_pad, dout_pad), lambda i: (0, 0)),
                      pl.BlockSpec((1, dout_pad), lambda i: (0, 0))],
            out_specs=pl.BlockSpec((tm, dout_pad), lambda i: (i, 0))),
        compiler_params=pltpu.CompilerParams(
            dimension_semantics=("parallel",),
            vmem_limit_bytes=_VMEM_LIMIT),
        cost_estimate=pl.CostEstimate(flops=flops,
                                      transcendentals=n_pad * dh_pad,
                                      bytes_accessed=bytes_accessed),
    )(h_f32, scale, shift, w_bf16, b_f32)


# ------------------------------- JAX glue ---------------------------------- #

def gcn_norm_dense(edge_index, num_nodes, edge_weight=None):
    """Dense D^-1/2 (A + I) D^-1/2 matching PyG gcn_norm (source_to_target)."""
    row = edge_index[0]
    col = edge_index[1]
    if edge_weight is None:
        edge_weight = jnp.ones(row.shape[0], jnp.float32)
    loop = jnp.arange(num_nodes, dtype=row.dtype)
    row = jnp.concatenate([row, loop])
    col = jnp.concatenate([col, loop])
    edge_weight = jnp.concatenate(
        [edge_weight.astype(jnp.float32), jnp.ones(num_nodes, jnp.float32)]
    )
    deg = jnp.zeros(num_nodes, jnp.float32).at[col].add(edge_weight)
    dinv = jnp.where(deg > 0, 1.0 / jnp.sqrt(deg), 0.0)
    norm = dinv[row] * edge_weight * dinv[col]
    # out[col] += norm * x[row]  =>  A_hat[col, row] = norm
    a_hat = jnp.zeros((num_nodes, num_nodes), jnp.float32).at[col, row].add(norm)
    return a_hat


def _pad2(x, rows, cols):
    return jnp.pad(x, ((0, rows - x.shape[0]), (0, cols - x.shape[1])))


def xavier_uniform(key, fan_in, fan_out, shape):
    bound = math.sqrt(6.0 / (fan_in + fan_out))
    return jax.random.uniform(key, shape, jnp.float32, -bound, bound)


def init_params(key, dim_node, dim_hidden, num_classes, num_layer=3):
    keys = jax.random.split(key, num_layer + 2)
    params = {}
    # conv lin weights: xavier; GCNConv biases are zero-init (and cancelled by
    # the following training-mode BatchNorm), so they are not stored.
    params["conv_w"] = [xavier_uniform(keys[0], dim_node, dim_hidden,
                                       (dim_node, dim_hidden))]
    for i in range(num_layer - 1):
        params["conv_w"].append(
            xavier_uniform(keys[1 + i], dim_hidden, dim_hidden,
                           (dim_hidden, dim_hidden)))
    # BatchNorm affine params (default gamma=1, beta=0).
    params["bn_gamma"] = [jnp.ones((dim_hidden,), jnp.float32)
                          for _ in range(num_layer)]
    params["bn_beta"] = [jnp.zeros((dim_hidden,), jnp.float32)
                         for _ in range(num_layer)]
    # FFN Linear: weight xavier (per reset_parameters), bias default nn.Linear.
    params["ffn_w"] = xavier_uniform(keys[-2], dim_hidden, num_classes,
                                     (dim_hidden, num_classes))
    b_bound = 1.0 / math.sqrt(dim_hidden)
    params["ffn_b"] = jax.random.uniform(keys[-1], (num_classes,), jnp.float32,
                                         -b_bound, b_bound)
    return params


def gcn_3l_gelu_forward(params, x, edge_index, edge_weights=None):
    n, din = x.shape
    dh = params["conv_w"][0].shape[1]
    ncls = params["ffn_w"].shape[1]
    num_layer = len(params["conv_w"])

    # Tiling: pad N to a lane multiple, then pick the largest row/contraction
    # tile in {512, 256, 128} that divides it; pad feature dims to 128 lanes.
    n_pad = _round_up(n, LANE)
    tile = next(t for t in (512, 256, 128) if n_pad % t == 0)
    din_pad = _round_up(din, LANE)
    dh_pad = _round_up(dh, LANE)
    ncls_pad = _round_up(ncls, LANE)

    # Dense normalized adjacency, bf16 at the kernel boundary.
    a_hat = gcn_norm_dense(edge_index, n, edge_weights)
    a_hat = _pad2(a_hat, n_pad, n_pad).astype(jnp.bfloat16)

    x_p = _pad2(x.astype(jnp.float32), n_pad, din_pad).astype(jnp.bfloat16)

    # Padded / bf16 weights (f32 accumulation happens on the MXU).
    conv_w = ([_pad2(params["conv_w"][0], din_pad, dh_pad).astype(jnp.bfloat16)]
              + [_pad2(w, dh_pad, dh_pad).astype(jnp.bfloat16)
                 for w in params["conv_w"][1:]])
    gammas = [_pad2(g.reshape(1, -1), 1, dh_pad) for g in params["bn_gamma"]]
    betas = [_pad2(b.reshape(1, -1), 1, dh_pad) for b in params["bn_beta"]]
    ffn_w = _pad2(params["ffn_w"], dh_pad, ncls_pad).astype(jnp.bfloat16)
    ffn_b = _pad2(params["ffn_b"].reshape(1, -1), 1, ncls_pad)
    zero_bias = jnp.zeros((1, dh_pad), jnp.float32)

    # Layer-1 feature projection: P1 = X @ W1.
    p = _project(x_p, conv_w[0], tile)

    out = None
    for l in range(num_layer):
        # Aggregation H = A_hat @ P with in-kernel partial BN statistics.
        h_raw, stats = _aggregate(a_hat, p, tile, tile)
        stats = stats.reshape(-1, 8, dh_pad)
        col_sum = jnp.sum(stats[:, 0, :], axis=0)
        col_sq = jnp.sum(stats[:, 1, :], axis=0)
        mean = col_sum / n                                # true N, not padded
        var = jnp.maximum(col_sq / n - mean * mean, 0.0)  # biased variance
        invstd = jax.lax.rsqrt(var + _BN_EPS)
        # Fold BN into one per-feature scale/shift (padded lanes stay zero
        # because gamma/beta are zero-padded).
        scale = (gammas[l][0] * invstd).reshape(1, dh_pad)
        shift = (betas[l][0] - mean * gammas[l][0] * invstd).reshape(1, dh_pad)

        if l + 1 < num_layer:
            # BN + GELU fused with the NEXT layer's feature projection.
            p = _bn_gelu_project(h_raw, scale, shift, conv_w[l + 1],
                                 zero_bias, tile, jnp.bfloat16)
        else:
            # readout = IdenticalPool (node level) -> identity.
            # BN + GELU fused with the FFN head.
            # TODO(synk): Dropout(p=0.3) is treated as identity (eval mode).
            out = _bn_gelu_project(h_raw, scale, shift, ffn_w, ffn_b,
                                   tile, jnp.float32)

    return out[:n, :ncls]


# --------------------------------- main ------------------------------------ #

if __name__ == "__main__":
    key = jax.random.PRNGKey(0)
    k_param, k_x, k_edge = jax.random.split(key, 3)

    num_nodes = 16
    dim_node = 8
    dim_hidden = 32
    num_classes = 4

    # deterministic small graph: bidirectional ring + a few random chords
    src_ring = jnp.arange(num_nodes, dtype=jnp.int32)
    dst_ring = (src_ring + 1) % num_nodes
    extra_src = jax.random.randint(k_edge, (8,), 0, num_nodes, jnp.int32)
    extra_dst = (extra_src + 5) % num_nodes
    src = jnp.concatenate([src_ring, dst_ring, extra_src, extra_dst])
    dst = jnp.concatenate([dst_ring, src_ring, extra_dst, extra_src])
    edge_index = jnp.stack([src, dst], axis=0)  # [2, E]

    x = jax.random.normal(k_x, (num_nodes, dim_node), jnp.float32)
    params = init_params(k_param, dim_node, dim_hidden, num_classes)

    out = jax.jit(gcn_3l_gelu_forward)(params, x, edge_index)
    out = jax.block_until_ready(out)
    assert out.shape == (num_nodes, num_classes)
    print("KERNEL_OK")
</pallas_src>

<mosaic_0001>
module attributes {stable_mosaic.version = 11 : i64} {
  func.func private @main(%arg0: i32) attributes {dimension_semantics = [#tpu.dimension_semantics<core_parallel>], iteration_bounds = array<i64: 2>, tpu.core_type = #tpu.core_type<sc_scalar_subcore>, window_params = []} {
    return
  }
}

module attributes {stable_mosaic.version = 11 : i64} {
  func.func private @main(%arg0: i32) attributes {dimension_semantics = [#tpu.dimension_semantics<core_parallel>], iteration_bounds = array<i64: 2>, tpu.core_type = #tpu.core_type<sc_scalar_subcore>, window_params = []} {
    return
  }
}

module attributes {stable_mosaic.version = 11 : i64} {
  func.func @_project_kernel(%arg0: i32, %arg1: memref<128x128xbf16, #tpu.memory_space<vmem>>, %arg2: memref<128x128xbf16, #tpu.memory_space<vmem>>, %arg3: memref<128x128xbf16, #tpu.memory_space<vmem>>) attributes {dimension_semantics = [#tpu.dimension_semantics<parallel>], iteration_bounds = array<i64: 1>, scalar_prefetch = 0 : i64, scratch_operands = 0 : i64, tpu.core_type = #tpu.core_type<tc>, window_params = [{transform_indices = @transform_0, window_bounds = array<i64: 128, 128>}, {pipeline_mode = #tpu.pipeline_mode<synchronous>, transform_indices = @transform_1, window_bounds = array<i64: 128, 128>}, {transform_indices = @transform_2, window_bounds = array<i64: 128, 128>}]} {
    %c0 = arith.constant 0 : index
    %c0_0 = arith.constant 0 : index
    %0 = vector.load %arg1[%c0, %c0_0] : memref<128x128xbf16, #tpu.memory_space<vmem>>, vector<128x128xbf16>
    %c0_1 = arith.constant 0 : index
    %c0_2 = arith.constant 0 : index
    %1 = vector.load %arg2[%c0_1, %c0_2] : memref<128x128xbf16, #tpu.memory_space<vmem>>, vector<128x128xbf16>
    %cst = arith.constant dense<0.000000e+00> : vector<128x128xf32>
    %2 = tpu.matmul %0, %1, %cst {dimension_numbers = #tpu.dot_dimension_numbers<[1], [0], [0], [1], [0, 0, 1, 1], [], []>} : vector<128x128xbf16>, vector<128x128xbf16>, vector<128x128xf32> -> vector<128x128xf32>
    %3 = arith.truncf %2 : vector<128x128xf32> to vector<128x128xbf16>
    %c0_3 = arith.constant 0 : index
    %c0_4 = arith.constant 0 : index
    %4 = vector.load %arg3[%c0_3, %c0_4] : memref<128x128xbf16, #tpu.memory_space<vmem>>, vector<128x128xbf16>
    tpu.vector_store %arg3[%c0_3, %c0_4], %3 {strides = array<i32>} : memref<128x128xbf16, #tpu.memory_space<vmem>>, vector<128x128xbf16>,
    return
  }
  func.func @transform_0(%arg0: i32) -> (i32, i32) {
    %c0_i32 = arith.constant 0 : i32
    %c0_i32_0 = arith.constant 0 : i32
    return %arg0, %c0_i32 : i32, i32
  }
  func.func @transform_1(%arg0: i32) -> (i32, i32) {
    %c0_i32 = arith.constant 0 : i32
    %c0_i32_0 = arith.constant 0 : i32
    %c0_i32_1 = arith.constant 0 : i32
    return %c0_i32, %c0_i32_0 : i32, i32
  }
  func.func @transform_2(%arg0: i32) -> (i32, i32) {
    %c0_i32 = arith.constant 0 : i32
    %c0_i32_0 = arith.constant 0 : i32
    return %arg0, %c0_i32 : i32, i32
  }
}

module attributes {stable_mosaic.version = 11 : i64} {
  func.func @_bn_gelu_project_kernel(%arg0: i32, %arg1: memref<128x128xf32, #tpu.memory_space<vmem>>, %arg2: memref<1x128xf32, #tpu.memory_space<vmem>>, %arg3: memref<1x128xf32, #tpu.memory_space<vmem>>, %arg4: memref<128x128xbf16, #tpu.memory_space<vmem>>, %arg5: memref<1x128xf32, #tpu.memory_space<vmem>>, %arg6: memref<128x128xbf16, #tpu.memory_space<vmem>>) attributes {dimension_semantics = [#tpu.dimension_semantics<parallel>], iteration_bounds = array<i64: 1>, scalar_prefetch = 0 : i64, scratch_operands = 0 : i64, tpu.core_type = #tpu.core_type<tc>, window_params = [{transform_indices = @transform_0, window_bounds = array<i64: 128, 128>}, {pipeline_mode = #tpu.pipeline_mode<synchronous>, transform_indices = @transform_1, window_bounds = array<i64: 1, 128>}, {pipeline_mode = #tpu.pipeline_mode<synchronous>, transform_indices = @transform_2, window_bounds = array<i64: 1, 128>}, {pipeline_mode = #tpu.pipeline_mode<synchronous>, transform_indices = @transform_3, window_bounds = array<i64: 128, 128>}, {pipeline_mode = #tpu.pipeline_mode<synchronous>, transform_indices = @transform_4, window_bounds = array<i64: 1, 128>}, {transform_indices = @transform_5, window_bounds = array<i64: 128, 128>}]} {
    %c0 = arith.constant 0 : index
    %c0_0 = arith.constant 0 : index
    %0 = vector.load %arg1[%c0, %c0_0] : memref<128x128xf32, #tpu.memory_space<vmem>>, vector<128x128xf32>
    %c0_1 = arith.constant 0 : index
    %c0_2 = arith.constant 0 : index
    %1 = vector.load %arg2[%c0_1, %c0_2] : memref<1x128xf32, #tpu.memory_space<vmem>>, vector<1x128xf32>
    %2 = vector.broadcast %1 : vector<1x128xf32> to vector<128x128xf32>
    %3 = arith.mulf %0, %2 : vector<128x128xf32>
    %c0_3 = arith.constant 0 : index
    %c0_4 = arith.constant 0 : index
    %4 = vector.load %arg3[%c0_3, %c0_4] : memref<1x128xf32, #tpu.memory_space<vmem>>, vector<1x128xf32>
    %5 = vector.broadcast %4 : vector<1x128xf32> to vector<128x128xf32>
    %6 = arith.addf %3, %5 : vector<128x128xf32>
    %cst = arith.constant 5.000000e-01 : f32
    %7 = vector.broadcast %cst : f32 to vector<128x128xf32>
    %8 = arith.mulf %7, %6 : vector<128x128xf32>
    %cst_5 = arith.constant 0.707106769 : f32
    %9 = vector.broadcast %cst_5 : f32 to vector<128x128xf32>
    %10 = arith.mulf %6, %9 : vector<128x128xf32>
    %11 = math.erf %10 : vector<128x128xf32>
    %cst_6 = arith.constant 1.000000e+00 : f32
    %12 = vector.broadcast %cst_6 : f32 to vector<128x128xf32>
    %13 = arith.addf %12, %11 : vector<128x128xf32>
    %14 = arith.mulf %8, %13 : vector<128x128xf32>
    %15 = arith.truncf %14 : vector<128x128xf32> to vector<128x128xbf16>
    %c0_7 = arith.constant 0 : index
    %c0_8 = arith.constant 0 : index
    %16 = vector.load %arg4[%c0_7, %c0_8] : memref<128x128xbf16, #tpu.memory_space<vmem>>, vector<128x128xbf16>
    %cst_9 = arith.constant dense<0.000000e+00> : vector<128x128xf32>
    %17 = tpu.matmul %15, %16, %cst_9 {dimension_numbers = #tpu.dot_dimension_numbers<[1], [0], [0], [1], [0, 0, 1, 1], [], []>} : vector<128x128xbf16>, vector<128x128xbf16>, vector<128x128xf32> -> vector<128x128xf32>
    %c0_10 = arith.constant 0 : index
    %c0_11 = arith.constant 0 : index
    %18 = vector.load %arg5[%c0_10, %c0_11] : memref<1x128xf32, #tpu.memory_space<vmem>>, vector<1x128xf32>
    %19 = vector.broadcast %18 : vector<1x128xf32> to vector<128x128xf32>
    %20 = arith.addf %17, %19 : vector<128x128xf32>
    %21 = arith.truncf %20 : vector<128x128xf32> to vector<128x128xbf16>
    %c0_12 = arith.constant 0 : index
    %c0_13 = arith.constant 0 : index
    %22 = vector.load %arg6[%c0_12, %c0_13] : memref<128x128xbf16, #tpu.memory_space<vmem>>, vector<128x128xbf16>
    tpu.vector_store %arg6[%c0_12, %c0_13], %21 {strides = array<i32>} : memref<128x128xbf16, #tpu.memory_space<vmem>>, vector<128x128xbf16>,
    return
  }
  func.func @transform_0(%arg0: i32) -> (i32, i32) {
    %c0_i32 = arith.constant 0 : i32
    %c0_i32_0 = arith.constant 0 : i32
    return %arg0, %c0_i32 : i32, i32
  }
  func.func @transform_1(%arg0: i32) -> (i32, i32) {
    %c0_i32 = arith.constant 0 : i32
    %c0_i32_0 = arith.constant 0 : i32
    %c0_i32_1 = arith.constant 0 : i32
    return %c0_i32, %c0_i32_0 : i32, i32
  }
  func.func @transform_2(%arg0: i32) -> (i32, i32) {
    %c0_i32 = arith.constant 0 : i32
    %c0_i32_0 = arith.constant 0 : i32
    %c0_i32_1 = arith.constant 0 : i32
    return %c0_i32, %c0_i32_0 : i32, i32
  }
  func.func @transform_3(%arg0: i32) -> (i32, i32) {
    %c0_i32 = arith.constant 0 : i32
    %c0_i32_0 = arith.constant 0 : i32
    %c0_i32_1 = arith.constant 0 : i32
    return %c0_i32, %c0_i32_0 : i32, i32
  }
  func.func @transform_4(%arg0: i32) -> (i32, i32) {
    %c0_i32 = arith.constant 0 : i32
    %c0_i32_0 = arith.constant 0 : i32
    %c0_i32_1 = arith.constant 0 : i32
    return %c0_i32, %c0_i32_0 : i32, i32
  }
  func.func @transform_5(%arg0: i32) -> (i32, i32) {
    %c0_i32 = arith.constant 0 : i32
    %c0_i32_0 = arith.constant 0 : i32
    return %arg0, %c0_i32 : i32, i32
  }
}

module attributes {stable_mosaic.version = 11 : i64} {
  func.func @_aggregate_kernel(%arg0: i32, %arg1: i32, %arg2: memref<128x128xbf16, #tpu.memory_space<vmem>>, %arg3: memref<128x128xbf16, #tpu.memory_space<vmem>>, %arg4: memref<128x128xf32, #tpu.memory_space<vmem>>, %arg5: memref<8x128xf32, #tpu.memory_space<vmem>>, %arg6: memref<128x128xf32, #tpu.memory_space<vmem>>) attributes {dimension_semantics = [#tpu.dimension_semantics<parallel>, #tpu.dimension_semantics<arbitrary>], iteration_bounds = array<i64: 1, 1>, scalar_prefetch = 0 : i64, scratch_operands = 1 : i64, tpu.core_type = #tpu.core_type<tc>, window_params = [{transform_indices = @transform_0, window_bounds = array<i64: 128, 128>}, {transform_indices = @transform_1, window_bounds = array<i64: 128, 128>}, {transform_indices = @transform_2, window_bounds = array<i64: 128, 128>}, {transform_indices = @transform_3, window_bounds = array<i64: 8, 128>}]} {
    %c0_i32 = arith.constant 0 : i32
    %0 = arith.cmpi eq, %arg1, %c0_i32 : i32
    %1 = arith.extui %0 : i1 to i32
    %c0_i32_0 = arith.constant 0 : i32
    %2 = arith.cmpi ne, %1, %c0_i32_0 : i32
    scf.if %2 {
      %cst_10 = arith.constant 0.000000e+00 : f32
      %12 = vector.broadcast %cst_10 : f32 to vector<128x128xf32>
      %c0_11 = arith.constant 0 : index
      %c0_12 = arith.constant 0 : index
      %13 = vector.load %arg6[%c0_11, %c0_12] : memref<128x128xf32, #tpu.memory_space<vmem>>, vector<128x128xf32>
      tpu.vector_store %arg6[%c0_11, %c0_12], %12 {strides = array<i32>} : memref<128x128xf32, #tpu.memory_space<vmem>>, vector<128x128xf32>,
    } else {
    }
    %c0 = arith.constant 0 : index
    %c0_1 = arith.constant 0 : index
    %3 = vector.load %arg6[%c0, %c0_1] : memref<128x128xf32, #tpu.memory_space<vmem>>, vector<128x128xf32>
    %c0_2 = arith.constant 0 : index
    %c0_3 = arith.constant 0 : index
    %4 = vector.load %arg2[%c0_2, %c0_3] : memref<128x128xbf16, #tpu.memory_space<vmem>>, vector<128x128xbf16>
    %c0_4 = arith.constant 0 : index
    %c0_5 = arith.constant 0 : index
    %5 = vector.load %arg3[%c0_4, %c0_5] : memref<128x128xbf16, #tpu.memory_space<vmem>>, vector<128x128xbf16>
    %cst = arith.constant dense<0.000000e+00> : vector<128x128xf32>
    %6 = tpu.matmul %4, %5, %cst {dimension_numbers = #tpu.dot_dimension_numbers<[1], [0], [0], [1], [0, 0, 1, 1], [], []>} : vector<128x128xbf16>, vector<128x128xbf16>, vector<128x128xf32> -> vector<128x128xf32>
    %7 = arith.addf %3, %6 : vector<128x128xf32>
    %c0_6 = arith.constant 0 : index
    %c0_7 = arith.constant 0 : index
    %8 = vector.load %arg6[%c0_6, %c0_7] : memref<128x128xf32, #tpu.memory_space<vmem>>, vector<128x128xf32>
    tpu.vector_store %arg6[%c0_6, %c0_7], %7 {strides = array<i32>} : memref<128x128xf32, #tpu.memory_space<vmem>>, vector<128x128xf32>,
    %c0_i32_8 = arith.constant 0 : i32
    %9 = arith.cmpi eq, %arg1, %c0_i32_8 : i32
    %10 = arith.extui %9 : i1 to i32
    %c0_i32_9 = arith.constant 0 : i32
    %11 = arith.cmpi ne, %10, %c0_i32_9 : i32
    scf.if %11 {
      %c0_10 = arith.constant 0 : index
      %c0_11 = arith.constant 0 : index
      %12 = vector.load %arg6[%c0_10, %c0_11] : memref<128x128xf32, #tpu.memory_space<vmem>>, vector<128x128xf32>
      %c0_12 = arith.constant 0 : index
      %c0_13 = arith.constant 0 : index
      %13 = vector.load %arg4[%c0_12, %c0_13] : memref<128x128xf32, #tpu.memory_space<vmem>>, vector<128x128xf32>
      tpu.vector_store %arg4[%c0_12, %c0_13], %12 {strides = array<i32>} : memref<128x128xf32, #tpu.memory_space<vmem>>, vector<128x128xf32>,
      %cst_14 = arith.constant dense<0.000000e+00> : vector<128xf32>
      %14 = vector.multi_reduction <add>, %12, %cst_14 [0] : vector<128x128xf32> to vector<128xf32>
      %15 = vector.shape_cast %14 : vector<128xf32> to vector<1x128xf32>
      %16 = arith.mulf %12, %12 : vector<128x128xf32>
      %cst_15 = arith.constant dense<0.000000e+00> : vector<128xf32>
      %17 = vector.multi_reduction <add>, %16, %cst_15 [0] : vector<128x128xf32> to vector<128xf32>
      %18 = vector.shape_cast %17 : vector<128xf32> to vector<1x128xf32>
      %cst_16 = arith.constant 0.000000e+00 : f32
      %19 = vector.broadcast %cst_16 : f32 to vector<6x128xf32>
      %20 = tpu.concatenate %15, %18, %19 in 0 : vector<1x128xf32>, vector<1x128xf32>, vector<6x128xf32> -> vector<8x128xf32>
      %c0_17 = arith.constant 0 : index
      %c0_18 = arith.constant 0 : index
      %21 = vector.load %arg5[%c0_17, %c0_18] : memref<8x128xf32, #tpu.memory_space<vmem>>, vector<8x128xf32>
      tpu.vector_store %arg5[%c0_17, %c0_18], %20 {strides = array<i32>} : memref<8x128xf32, #tpu.memory_space<vmem>>, vector<8x128xf32>,
    } else {
    }
    return
  }
  func.func @transform_0(%arg0: i32, %arg1: i32) -> (i32, i32) {
    %c0_i32 = arith.constant 0 : i32
    return %arg0, %arg1 : i32, i32
  }
  func.func @transform_1(%arg0: i32, %arg1: i32) -> (i32, i32) {
    %c0_i32 = arith.constant 0 : i32
    %c0_i32_0 = arith.constant 0 : i32
    return %arg1, %c0_i32 : i32, i32
  }
  func.func @transform_2(%arg0: i32, %arg1: i32) -> (i32, i32) {
    %c0_i32 = arith.constant 0 : i32
    %c0_i32_0 = arith.constant 0 : i32
    return %arg0, %c0_i32 : i32, i32
  }
  func.func @transform_3(%arg0: i32, %arg1: i32) -> (i32, i32) {
    %c0_i32 = arith.constant 0 : i32
    %c0_i32_0 = arith.constant 0 : i32
    return %arg0, %c0_i32 : i32, i32
  }
}

module attributes {stable_mosaic.version = 11 : i64} {
  func.func @_bn_gelu_project_kernel(%arg0: i32, %arg1: memref<128x128xf32, #tpu.memory_space<vmem>>, %arg2: memref<1x128xf32, #tpu.memory_space<vmem>>, %arg3: memref<1x128xf32, #tpu.memory_space<vmem>>, %arg4: memref<128x128xbf16, #tpu.memory_space<vmem>>, %arg5: memref<1x128xf32, #tpu.memory_space<vmem>>, %arg6: memref<128x128xf32, #tpu.memory_space<vmem>>) attributes {dimension_semantics = [#tpu.dimension_semantics<parallel>], iteration_bounds = array<i64: 1>, scalar_prefetch = 0 : i64, scratch_operands = 0 : i64, tpu.core_type = #tpu.core_type<tc>, window_params = [{transform_indices = @transform_0, window_bounds = array<i64: 128, 128>}, {pipeline_mode = #tpu.pipeline_mode<synchronous>, transform_indices = @transform_1, window_bounds = array<i64: 1, 128>}, {pipeline_mode = #tpu.pipeline_mode<synchronous>, transform_indices = @transform_2, window_bounds = array<i64: 1, 128>}, {pipeline_mode = #tpu.pipeline_mode<synchronous>, transform_indices = @transform_3, window_bounds = array<i64: 128, 128>}, {pipeline_mode = #tpu.pipeline_mode<synchronous>, transform_indices = @transform_4, window_bounds = array<i64: 1, 128>}, {transform_indices = @transform_5, window_bounds = array<i64: 128, 128>}]} {
    %c0 = arith.constant 0 : index
    %c0_0 = arith.constant 0 : index
    %0 = vector.load %arg1[%c0, %c0_0] : memref<128x128xf32, #tpu.memory_space<vmem>>, vector<128x128xf32>
    %c0_1 = arith.constant 0 : index
    %c0_2 = arith.constant 0 : index
    %1 = vector.load %arg2[%c0_1, %c0_2] : memref<1x128xf32, #tpu.memory_space<vmem>>, vector<1x128xf32>
    %2 = vector.broadcast %1 : vector<1x128xf32> to vector<128x128xf32>
    %3 = arith.mulf %0, %2 : vector<128x128xf32>
    %c0_3 = arith.constant 0 : index
    %c0_4 = arith.constant 0 : index
    %4 = vector.load %arg3[%c0_3, %c0_4] : memref<1x128xf32, #tpu.memory_space<vmem>>, vector<1x128xf32>
    %5 = vector.broadcast %4 : vector<1x128xf32> to vector<128x128xf32>
    %6 = arith.addf %3, %5 : vector<128x128xf32>
    %cst = arith.constant 5.000000e-01 : f32
    %7 = vector.broadcast %cst : f32 to vector<128x128xf32>
    %8 = arith.mulf %7, %6 : vector<128x128xf32>
    %cst_5 = arith.constant 0.707106769 : f32
    %9 = vector.broadcast %cst_5 : f32 to vector<128x128xf32>
    %10 = arith.mulf %6, %9 : vector<128x128xf32>
    %11 = math.erf %10 : vector<128x128xf32>
    %cst_6 = arith.constant 1.000000e+00 : f32
    %12 = vector.broadcast %cst_6 : f32 to vector<128x128xf32>
    %13 = arith.addf %12, %11 : vector<128x128xf32>
    %14 = arith.mulf %8, %13 : vector<128x128xf32>
    %15 = arith.truncf %14 : vector<128x128xf32> to vector<128x128xbf16>
    %c0_7 = arith.constant 0 : index
    %c0_8 = arith.constant 0 : index
    %16 = vector.load %arg4[%c0_7, %c0_8] : memref<128x128xbf16, #tpu.memory_space<vmem>>, vector<128x128xbf16>
    %cst_9 = arith.constant dense<0.000000e+00> : vector<128x128xf32>
    %17 = tpu.matmul %15, %16, %cst_9 {dimension_numbers = #tpu.dot_dimension_numbers<[1], [0], [0], [1], [0, 0, 1, 1], [], []>} : vector<128x128xbf16>, vector<128x128xbf16>, vector<128x128xf32> -> vector<128x128xf32>
    %c0_10 = arith.constant 0 : index
    %c0_11 = arith.constant 0 : index
    %18 = vector.load %arg5[%c0_10, %c0_11] : memref<1x128xf32, #tpu.memory_space<vmem>>, vector<1x128xf32>
    %19 = vector.broadcast %18 : vector<1x128xf32> to vector<128x128xf32>
    %20 = arith.addf %17, %19 : vector<128x128xf32>
    %c0_12 = arith.constant 0 : index
    %c0_13 = arith.constant 0 : index
    %21 = vector.load %arg6[%c0_12, %c0_13] : memref<128x128xf32, #tpu.memory_space<vmem>>, vector<128x128xf32>
    tpu.vector_store %arg6[%c0_12, %c0_13], %20 {strides = array<i32>} : memref<128x128xf32, #tpu.memory_space<vmem>>, vector<128x128xf32>,
    return
  }
  func.func @transform_0(%arg0: i32) -> (i32, i32) {
    %c0_i32 = arith.constant 0 : i32
    %c0_i32_0 = arith.constant 0 : i32
    return %arg0, %c0_i32 : i32, i32
  }
  func.func @transform_1(%arg0: i32) -> (i32, i32) {
    %c0_i32 = arith.constant 0 : i32
    %c0_i32_0 = arith.constant 0 : i32
    %c0_i32_1 = arith.constant 0 : i32
    return %c0_i32, %c0_i32_0 : i32, i32
  }
  func.func @transform_2(%arg0: i32) -> (i32, i32) {
    %c0_i32 = arith.constant 0 : i32
    %c0_i32_0 = arith.constant 0 : i32
    %c0_i32_1 = arith.constant 0 : i32
    return %c0_i32, %c0_i32_0 : i32, i32
  }
  func.func @transform_3(%arg0: i32) -> (i32, i32) {
    %c0_i32 = arith.constant 0 : i32
    %c0_i32_0 = arith.constant 0 : i32
    %c0_i32_1 = arith.constant 0 : i32
    return %c0_i32, %c0_i32_0 : i32, i32
  }
  func.func @transform_4(%arg0: i32) -> (i32, i32) {
    %c0_i32 = arith.constant 0 : i32
    %c0_i32_0 = arith.constant 0 : i32
    %c0_i32_1 = arith.constant 0 : i32
    return %c0_i32, %c0_i32_0 : i32, i32
  }
  func.func @transform_5(%arg0: i32) -> (i32, i32) {
    %c0_i32 = arith.constant 0 : i32
    %c0_i32_0 = arith.constant 0 : i32
    return %arg0, %c0_i32 : i32, i32
  }
}

</mosaic_0001>

<bundles_post_ra>
// kernel: mul.13
= control target key start
LH: loop header
LB: loop body
LE: loop exit
PB: predicated region body
PF: predicated region fallthrough
CT: control target
= control target key end

     0   :  { %s34_s0 = inlined_call_operand.vmem [shape: f32[64], index: 0, kind: input, shape index: {}]   ;;  %s35_s1 = inlined_call_operand.vmem [shape: f32[64], index: 1, kind: input, shape index: {}]   ;;  %s36_s2 = inlined_call_operand.vmem [shape: f32[64], index: 2, kind: output, shape index: {}]  }
   0x1   :  { %v3_v0 = vld [vmem:[%s34_s0] sm:$0x1] }
   0x2   :  { %v4_v1 = vld [vmem:[%s35_s1] sm:$0x1] }
   0x3   :  { %v7_v2 = vmul.f32 %v4_v1, %v3_v0 }
   0x5   :  { %9 = vst [vmem:[%s36_s2] sm:$0x1] %v7_v2 }

// kernel: gcn_3l_gelu_forward.7
= control target key start
LH: loop header
LB: loop body
LE: loop exit
PB: predicated region body
PF: predicated region fallthrough
CT: control target
= control target key end

     0   :  { %s583_s1 = inlined_call_operand.vmem [shape: bf16[128,128], index: 1, kind: input, shape index: {}]   ;;  %s584_s0 = inlined_call_operand.vmem [shape: bf16[128,128], index: 0, kind: input, shape index: {}]   ;;  %s585_s2 = inlined_call_operand.vmem [shape: bf16[128,128], index: 2, kind: output, shape index: {}]  }
   0x1   :  { %v480_v0 = vld [vmem:[%s583_s1] sm:$0xff]   ;;  %v481_v1 = vld [vmem:[%s583_s1 + $0x8] sm:$0xff]   ;;  %v482_v2 = vld [vmem:[%s583_s1 + $0x10] sm:$0xff]  }
   0x2   :  { %432 = vmatprep.subr.bf16.mxu0 %v480_v0  ;;  %464 = vmatprep.subr.bf16.mxu1 %v480_v0  ;;  %v483_v3 = vld [vmem:[%s583_s1 + $0x18] sm:$0xff]   ;;  %v488_v4 = vld [vmem:[%s584_s0] sm:$0xff]   ;;  %v485_v7 = vld [vmem:[%s583_s1 + $0x28] sm:$0xff]  }
   0x3   :  { %433 = vmatpush3.bf16.msra.mxu0 %v480_v0  ;;  %472 = vmatpush3.bf16.msra.mxu1 %v480_v0  ;;  %v489_v5 = vld [vmem:[%s584_s0 + $0x20] sm:$0xff]   ;;  %v486_v8 = vld [vmem:[%s583_s1 + $0x30] sm:$0xff]   ;;  %v487_v9 = vld [vmem:[%s583_s1 + $0x38] sm:$0xff]  }
   0x4   :  { %434 = vmatprep.subr.bf16.mxu0 %v481_v1  ;;  %465 = vmatprep.subr.bf16.mxu1 %v481_v1  ;;  %v484_v6 = vld [vmem:[%s583_s1 + $0x20] sm:$0xff]   ;;  %v490_v10 = vld [vmem:[%s584_s0 + $0x8] sm:$0xff]   ;;  %v492_v12 = vld [vmem:[%s584_s0 + $0x10] sm:$0xff]  }
   0x5   :  { %448 = vmatprep.mubr.bf16.mxu0 %v488_v4  ;;  %456 = vmatprep.mubr.bf16.mxu1 %v489_v5  ;;  %v491_v11 = vld [vmem:[%s584_s0 + $0x28] sm:$0xff]   ;;  %v493_v13 = vld [vmem:[%s584_s0 + $0x30] sm:$0xff]   ;;  %v494_v14 = vld [vmem:[%s584_s0 + $0x18] sm:$0xff]  }
   0x6   :  { %v495_v15 = vld [vmem:[%s584_s0 + $0x38] sm:$0xff]  }
   0x7   :  { %435 = vmatpush3.bf16.msra.mxu0 %v481_v1  ;;  %473 = vmatpush3.bf16.msra.mxu1 %v481_v1 }
   0x8   :  { %436 = vmatprep.subr.bf16.mxu0 %v482_v2  ;;  %466 = vmatprep.subr.bf16.mxu1 %v482_v2 }
   0xb   :  { %437 = vmatpush3.bf16.msra.mxu0 %v482_v2  ;;  %474 = vmatpush3.bf16.msra.mxu1 %v482_v2 }
   0xc   :  { %438 = vmatprep.subr.bf16.mxu0 %v483_v3  ;;  %467 = vmatprep.subr.bf16.mxu1 %v483_v3 }
   0xf   :  { %439 = vmatpush3.bf16.msra.mxu0 %v483_v3  ;;  %475 = vmatpush3.bf16.msra.mxu1 %v483_v3 }
  0x10   :  { %440 = vmatprep.subr.bf16.mxu0 %v484_v6  ;;  %468 = vmatprep.subr.bf16.mxu1 %v484_v6 }
  0x13   :  { %441 = vmatpush3.bf16.msra.mxu0 %v484_v6  ;;  %476 = vmatpush3.bf16.msra.mxu1 %v484_v6 }
  0x14   :  { %442 = vmatprep.subr.bf16.mxu0 %v485_v7  ;;  %469 = vmatprep.subr.bf16.mxu1 %v485_v7 }
  0x17   :  { %443 = vmatpush3.bf16.msra.mxu0 %v485_v7  ;;  %477 = vmatpush3.bf16.msra.mxu1 %v485_v7 }
  0x18   :  { %444 = vmatprep.subr.bf16.mxu0 %v486_v8  ;;  %470 = vmatprep.subr.bf16.mxu1 %v486_v8 }
  0x1b   :  { %445 = vmatpush3.bf16.msra.mxu0 %v486_v8  ;;  %478 = vmatpush3.bf16.msra.mxu1 %v486_v8 }
  0x1c   :  { %446 = vmatprep.subr.bf16.mxu0 %v487_v9  ;;  %471 = vmatprep.subr.bf16.mxu1 %v487_v9 }
  0x1f   :  { %447 = vmatpush3.bf16.msra.mxu0 %v487_v9  ;;  %479 = vmatpush3.bf16.msra.mxu1 %v487_v9 }
  0x22   :  { %449 = vmatmul.mubr.bf16.vlgmr.msra.gmra.mrb[0].mxu0 %v490_v10  ;;  %457 = vmatmul.mubr.bf16.vlgmr.msra.gmra.mrb[0].mxu1 %v491_v11 }
  0x23   :  { %452 = vmatprep.mubr.bf16.mxu0 %v492_v12  ;;  %460 = vmatprep.mubr.bf16.mxu1 %v493_v13 }
  0x2a   :  { %453 = vmatmul.mubr.bf16.gmra.mrb[4].mxu0 %v494_v14  ;;  %461 = vmatmul.mubr.bf16.gmra.mrb[4].mxu1 %v495_v15 }
  0xf5   :  { %v450_v16 = vpop.f32.mrb[0].mxu0  ;;  %v458_v17 = vpop.f32.mrb[0].mxu1 }
  0xf6   :  { %v174_v18 = vpop.f32.mrb[1].mxu0  ;;  %v206_v19 = vpop.f32.mrb[1].mxu1 }
  0xf7   :  { %v451_v20 = vpop.f32.mrb[2].mxu0  ;;  %v459_v21 = vpop.f32.mrb[2].mxu1 }
  0xf8   :  { %v377_v22 = vpack.c.bf16 %v451_v20, %v450_v16  ;;  %v397_v23 = vpack.c.bf16 %v459_v21, %v458_v17  ;;  %v177_v24 = vpop.f32.mrb[3].mxu0  ;;  %v209_v25 = vpop.f32.mrb[3].mxu1 }
  0xf9   :  { %v372_v26 = vpack.c.bf16 %v177_v24, %v174_v18  ;;  %v392_v27 = vpack.c.bf16 %v209_v25, %v206_v19 }
  0xfa   :  { %409 = vst [vmem:[%s585_s2 + $0x8] sm:$0xff] %v377_v22   ;;  %413 = vst [vmem:[%s585_s2 + $0x28] sm:$0xff] %v397_v23  }
  0xfb   :  { %373 = vst [vmem:[%s585_s2] sm:$0xff] %v372_v26   ;;  %412 = vst [vmem:[%s585_s2 + $0x20] sm:$0xff] %v392_v27  }
  0xfd   :  { %v454_v28 = vpop.f32.mrb[4].mxu0  ;;  %v462_v29 = vpop.f32.mrb[4].mxu1 }
  0xfe   :  { %v190_v30 = vpop.f32.mrb[5].mxu0  ;;  %v222_v31 = vpop.f32.mrb[5].mxu1 }
  0xff   :  { %v455_v32 = vpop.f32.mrb[6].mxu0  ;;  %v463_v33 = vpop.f32.mrb[6].mxu1 }
 0x100   :  { %v387_v34 = vpack.c.bf16 %v455_v32, %v454_v28  ;;  %v407_v35 = vpack.c.bf16 %v463_v33, %v462_v29  ;;  %v193_v36 = vpop.f32.mrb[7].mxu0  ;;  %v225_v37 = vpop.f32.mrb[7].mxu1 }
 0x101   :  { %v382_v38 = vpack.c.bf16 %v193_v36, %v190_v30  ;;  %v402_v39 = vpack.c.bf16 %v225_v37, %v222_v31 }
 0x102   :  { %411 = vst [vmem:[%s585_s2 + $0x18] sm:$0xff] %v387_v34   ;;  %415 = vst [vmem:[%s585_s2 + $0x38] sm:$0xff] %v407_v35  }
 0x103   :  { %410 = vst [vmem:[%s585_s2 + $0x10] sm:$0xff] %v382_v38   ;;  %414 = vst [vmem:[%s585_s2 + $0x30] sm:$0xff] %v402_v39  }

// kernel: gcn_3l_gelu_forward.9
= control target key start
LH: loop header
LB: loop body
LE: loop exit
PB: predicated region body
PF: predicated region fallthrough
CT: control target
= control target key end

     0   :  { %s828_s3 = inlined_call_operand.vmem [shape: bf16[128,128], index: 3, kind: input, shape index: {}]   ;;  %s829_s0 = inlined_call_operand.vmem [shape: f32[128,128], index: 0, kind: input, shape index: {}]   ;;  %s830_s1 = inlined_call_operand.vmem [shape: f32[1,128], index: 1, kind: input, shape index: {}]   ;;  %s831_s2 = inlined_call_operand.vmem [shape: f32[1,128], index: 2, kind: input, shape index: {}]   ;;  %s832_s4 = inlined_call_operand.vmem [shape: f32[1,128], index: 4, kind: input, shape index: {}]   ;;  %s833_s5 = inlined_call_operand.vmem [shape: bf16[128,128], index: 5, kind: output, shape index: {}]  }
   0x1   :  { %v577_v0 = vld [vmem:[%s828_s3] sm:$0xff]   ;;  %v578_v1 = vld [vmem:[%s828_s3 + $0x8] sm:$0xff]   ;;  %v579_v2 = vld [vmem:[%s828_s3 + $0x10] sm:$0xff]  }
   0x2   :  { %529 = vmatprep.subr.bf16.mxu0 %v577_v0  ;;  %561 = vmatprep.subr.bf16.mxu1 %v577_v0  ;;  %v580_v3 = vld [vmem:[%s828_s3 + $0x18] sm:$0xff]   ;;  %v21_v4 = vld [vmem:[%s829_s0] sm:$0xff]  ;;  %v22_v5 = vld [vmem:[%s829_s0 + $0x8] sm:$0xff] }
   0x3   :  { %530 = vmatpush3.bf16.msra.mxu0 %v577_v0  ;;  %569 = vmatpush3.bf16.msra.mxu1 %v577_v0  ;;  %v668_v6 = vld [vmem:[%s830_s1] ss:$0 sm:$0xff]  ;;  %v30_v11 = vld [vmem:[%s829_s0 + $0x48] sm:$0xff]  ;;  %v23_v14 = vld [vmem:[%s829_s0 + $0x10] sm:$0xff] }
   0x4   :  { %531 = vmatprep.subr.bf16.mxu0 %v578_v1  ;;  %562 = vmatprep.subr.bf16.mxu1 %v578_v1  ;;  %v44_v7 = vmul.f32 %v668_v6, %v21_v4  ;;  %v45_v8 = vmul.f32 %v668_v6, %v22_v5  ;;  %v675_v9 = vld [vmem:[%s831_s2] ss:$0 sm:$0xff]  ;;  %v53_v13 = vmul.f32 %v668_v6, %v30_v11  ;;  %v24_v15 = vld [vmem:[%s829_s0 + $0x18] sm:$0xff]  ;;  %v31_v23 = vld [vmem:[%s829_s0 + $0x50] sm:$0xff] }
   0x5   :  { %v29_v10 = vld [vmem:[%s829_s0 + $0x40] sm:$0xff]  ;;  %v46_v18 = vmul.f32 %v668_v6, %v23_v14  ;;  %v47_v22 = vmul.f32 %v668_v6, %v24_v15  ;;  %v32_v24 = vld [vmem:[%s829_s0 + $0x58] sm:$0xff]  ;;  %v26_v28 = vld [vmem:[%s829_s0 + $0x28] sm:$0xff]  ;;  %v54_v33 = vmul.f32 %v668_v6, %v31_v23 }
   0x6   :  { %v52_v12 = vmul.f32 %v668_v6, %v29_v10  ;;  %v67_v16 = vadd.f32 %v675_v9, %v44_v7  ;;  %v68_v17 = vadd.f32 %v675_v9, %v45_v8  ;;  %v581_v19 = vld [vmem:[%s828_s3 + $0x20] sm:$0xff]   ;;  %v76_v21 = vadd.f32 %v675_v9, %v53_v13  ;;  %v582_v34 = vld [vmem:[%s828_s3 + $0x28] sm:$0xff]   ;;  %v583_v47 = vld [vmem:[%s828_s3 + $0x30] sm:$0xff]  }
   0x7   :  { %532 = vmatpush3.bf16.msra.mxu0 %v578_v1  ;;  %570 = vmatpush3.bf16.msra.mxu1 %v578_v1  ;;  %v25_v27 = vld [vmem:[%s829_s0 + $0x20] sm:$0xff]  ;;  %v713_v31 = vadd.f32 %v675_v9, %v46_v18  ;;  %v716_v32 = vadd.f32 %v675_v9, %v47_v22  ;;  %v55_v35 = vmul.f32 %v668_v6, %v32_v24  ;;  %v34_v45 = vld [vmem:[%s829_s0 + $0x68] sm:$0xff]  ;;  %v27_v49 = vld [vmem:[%s829_s0 + $0x30] sm:$0xff] }
   0x8   :  { %533 = vmatprep.subr.bf16.mxu0 %v579_v2  ;;  %563 = vmatprep.subr.bf16.mxu1 %v579_v2  ;;  %v75_v20 = vadd.f32 %v675_v9, %v52_v12  ;;  %v99_v25 = vmul.f32 0.70710677, %v67_v16  ;;  %v100_v26 = vmul.f32 0.70710677, %v68_v17  ;;  %v108_v30 = vmul.f32 0.70710677, %v76_v21 }
   0x9   :  { %v48_v36 = vmul.f32 %v668_v6, %v25_v27  ;;  %v49_v37 = vmul.f32 %v668_v6, %v26_v28  ;;  %v33_v38 = vld [vmem:[%s829_s0 + $0x60] sm:$0xff]  ;;  %v101_v39 = vmul.f32 0.70710677, %v713_v31  ;;  %v102_v40 = vmul.f32 0.70710677, %v716_v32  ;;  %v28_v50 = vld [vmem:[%s829_s0 + $0x38] sm:$0xff] }
   0xa   :  { %v107_v29 = vmul.f32 0.70710677, %v75_v20  ;;  %585 = verf.f32 %v99_v25  ;;  %v731_v41 = vadd.f32 %v675_v9, %v54_v33  ;;  %v734_v42 = vadd.f32 %v675_v9, %v55_v35  ;;  %v35_v58 = vld [vmem:[%s829_s0 + $0x70] sm:$0xff]  ;;  %v36_v62 = vld [vmem:[%s829_s0 + $0x78] sm:$0xff] }
   0xb   :  { %534 = vmatpush3.bf16.msra.mxu0 %v579_v2  ;;  %571 = vmatpush3.bf16.msra.mxu1 %v579_v2  ;;  %587 = verf.f32 %v100_v26  ;;  %v737_v43 = vadd.f32 %v675_v9, %v48_v36  ;;  %v740_v44 = vadd.f32 %v675_v9, %v49_v37  ;;  %v56_v46 = vmul.f32 %v668_v6, %v33_v38  ;;  %v584_v63 = vld [vmem:[%s828_s3 + $0x38] sm:$0xff]  }
   0xc   :  { %535 = vmatprep.subr.bf16.mxu0 %v580_v3  ;;  %564 = vmatprep.subr.bf16.mxu1 %v580_v3  ;;  %589 = verf.f32 %v107_v29  ;;  %v109_v48 = vmul.f32 0.70710677, %v731_v41  ;;  %v83_v51 = vmul.f32 0.5, %v67_v16  ;;  %v84_v52 = vmul.f32 0.5, %v68_v17 }
   0xd   :  { %591 = verf.f32 %v108_v30  ;;  %v110_v53 = vmul.f32 0.70710677, %v734_v42  ;;  %v103_v54 = vmul.f32 0.70710677, %v737_v43  ;;  %v104_v55 = vmul.f32 0.70710677, %v740_v44 }
   0xe   :  { %593 = verf.f32 %v101_v39  ;;  %v57_v56 = vmul.f32 %v668_v6, %v34_v45  ;;  %v761_v57 = vadd.f32 %v675_v9, %v56_v46  ;;  %v91_v59 = vmul.f32 0.5, %v75_v20 }
   0xf   :  { %536 = vmatpush3.bf16.msra.mxu0 %v580_v3  ;;  %572 = vmatpush3.bf16.msra.mxu1 %v580_v3  ;;  %595 = verf.f32 %v102_v40  ;;  %v50_v60 = vmul.f32 %v668_v6, %v27_v49  ;;  %v51_v61 = vmul.f32 %v668_v6, %v28_v50  ;;  %v92_v0 = vmul.f32 0.5, %v76_v21 }
  0x10   :  { %537 = vmatprep.subr.bf16.mxu0 %v581_v19  ;;  %565 = vmatprep.subr.bf16.mxu1 %v581_v19  ;;  %597 = verf.f32 %v109_v48  ;;  %v775_v1 = vadd.f32 %v675_v9, %v57_v56  ;;  %v111_v2 = vmul.f32 0.70710677, %v761_v57  ;;  %v58_v7 = vmul.f32 %v668_v6, %v35_v58 }
  0x11   :  { %599 = verf.f32 %v110_v53  ;;  %v779_v4 = vadd.f32 %v675_v9, %v50_v60  ;;  %v782_v5 = vadd.f32 %v675_v9, %v51_v61  ;;  %v59_v12 = vmul.f32 %v668_v6, %v36_v62 }
  0x12   :  { %601 = verf.f32 %v103_v54  ;;  %v112_v11 = vmul.f32 0.70710677, %v775_v1  ;;  %v85_v15 = vmul.f32 0.5, %v713_v31  ;;  %v86_v16 = vmul.f32 0.5, %v716_v32 }
  0x13   :  { %538 = vmatpush3.bf16.msra.mxu0 %v581_v19  ;;  %573 = vmatpush3.bf16.msra.mxu1 %v581_v19  ;;  %603 = verf.f32 %v104_v55  ;;  %v105_v17 = vmul.f32 0.70710677, %v779_v4  ;;  %v106_v21 = vmul.f32 0.70710677, %v782_v5  ;;  %v81_v24 = vadd.f32 %v675_v9, %v58_v7 }
  0x14   :  { %539 = vmatprep.subr.bf16.mxu0 %v582_v34  ;;  %566 = vmatprep.subr.bf16.mxu1 %v582_v34  ;;  %v586_v3 = vpop.eup %585  ;;  %605 = verf.f32 %v111_v2  ;;  %v82_v28 = vadd.f32 %v675_v9, %v59_v12  ;;  %v93_v32 = vmul.f32 0.5, %v731_v41  ;;  %v94_v35 = vmul.f32 0.5, %v734_v42 }
  0x15   :  { %v588_v8 = vpop.eup %587  ;;  %v131_v10 = vadd.f32 1.0, %v586_v3  ;;  %607 = verf.f32 %v112_v11  ;;  %v113_v36 = vmul.f32 0.70710677, %v81_v24  ;;  %v87_v9 = vmul.f32 0.5, %v737_v43 }
  0x16   :  { %v590_v13 = vpop.eup %589  ;;  %v132_v14 = vadd.f32 1.0, %v588_v8  ;;  %609 = verf.f32 %v105_v17  ;;  %v114_v37 = vmul.f32 0.70710677, %v82_v28  ;;  %v88_v48 = vmul.f32 0.5, %v740_v44 }
  0x17   :  { %540 = vmatpush3.bf16.msra.mxu0 %v582_v34  ;;  %574 = vmatpush3.bf16.msra.mxu1 %v582_v34  ;;  %v592_v18 = vpop.eup %591  ;;  %v147_v19 = vmul.f32 %v131_v10, %v83_v51  ;;  %v139_v20 = vadd.f32 1.0, %v590_v13  ;;  %611 = verf.f32 %v106_v21  ;;  %v95_v49 = vmul.f32 0.5, %v761_v57  ;;  %v425_v21 = vld [vmem:[%s832_s4] ss:$0 sm:$0xff] }
  0x18   :  { %541 = vmatprep.subr.bf16.mxu0 %v583_v47  ;;  %567 = vmatprep.subr.bf16.mxu1 %v583_v47  ;;  %v594_v22 = vpop.eup %593  ;;  %v148_v6 = vmul.f32 %v132_v14, %v84_v52  ;;  %v140_v23 = vadd.f32 1.0, %v592_v18  ;;  %613 = verf.f32 %v113_v36  ;;  %v96_v43 = vmul.f32 0.5, %v775_v1 }
  0x19   :  { %v596_v25 = vpop.eup %595  ;;  %v155_v26 = vmul.f32 %v139_v20, %v91_v59  ;;  %v133_v27 = vadd.f32 1.0, %v594_v22  ;;  %615 = verf.f32 %v114_v37  ;;  %v89_v57 = vmul.f32 0.5, %v779_v4 }
  0x1a   :  { %v163_v29 = vpack.c.bf16 %v148_v6, %v147_v19  ;;  %v156_v30 = vmul.f32 %v140_v23, %v92_v0  ;;  %v134_v31 = vadd.f32 1.0, %v596_v25  ;;  %v598_v33 = vpop.eup %597  ;;  %v97_v12 = vmul.f32 0.5, %v81_v24 }
  0x1b   :  { %542 = vmatpush3.bf16.msra.mxu0 %v583_v47  ;;  %575 = vmatpush3.bf16.msra.mxu1 %v583_v47  ;;  %v149_v34 = vmul.f32 %v133_v27, %v85_v15  ;;  %v600_v38 = vpop.eup %599  ;;  %v141_v45 = vadd.f32 1.0, %v598_v33  ;;  %v98_v14 = vmul.f32 0.5, %v82_v28 }
  0x1c   :  { %543 = vmatprep.subr.bf16.mxu0 %v584_v63  ;;  %568 = vmatprep.subr.bf16.mxu1 %v584_v63  ;;  %v167_v39 = vpack.c.bf16 %v156_v30, %v155_v26  ;;  %v150_v40 = vmul.f32 %v134_v31, %v86_v16  ;;  %v602_v46 = vpop.eup %601  ;;  %v142_v47 = vadd.f32 1.0, %v600_v38 }
  0x1d   :  { %545 = vmatprep.mubr.bf16.mxu0 %v163_v29  ;;  %v604_v41 = vpop.eup %603  ;;  %v157_v42 = vmul.f32 %v141_v45, %v93_v32  ;;  %v135_v51 = vadd.f32 1.0, %v602_v46 }
  0x1e   :  { %553 = vmatprep.mubr.bf16.mxu1 %v167_v39  ;;  %v164_v50 = vpack.c.bf16 %v150_v40, %v149_v34  ;;  %v606_v52 = vpop.eup %605  ;;  %v158_v53 = vmul.f32 %v142_v47, %v94_v35  ;;  %v136_v54 = vadd.f32 1.0, %v604_v41 }
  0x1f   :  { %544 = vmatpush3.bf16.msra.mxu0 %v584_v63  ;;  %576 = vmatpush3.bf16.msra.mxu1 %v584_v63  ;;  %v151_v55 = vmul.f32 %v135_v51, %v87_v9  ;;  %v143_v56 = vadd.f32 1.0, %v606_v52  ;;  %v608_v58 = vpop.eup %607  ;;  %v90_v63 = vmul.f32 0.5, %v782_v5 }
  0x20   :  { %v168_v59 = vpack.c.bf16 %v158_v53, %v157_v42  ;;  %v152_v44 = vmul.f32 %v136_v54, %v88_v48  ;;  %v610_v60 = vpop.eup %609  ;;  %v144_v61 = vadd.f32 1.0, %v608_v58 }
  0x21   :  { %v159_v62 = vmul.f32 %v143_v56, %v95_v49  ;;  %v612_v0 = vpop.eup %611  ;;  %v137_v3 = vadd.f32 1.0, %v610_v60 }
  0x22   :  { %546 = vmatmul.mubr.bf16.vlgmr.msra.gmra.mrb[0].mxu0 %v164_v50  ;;  %554 = vmatmul.mubr.bf16.vlgmr.msra.gmra.mrb[0].mxu1 %v168_v59  ;;  %v165_v2 = vpack.c.bf16 %v152_v44, %v151_v55  ;;  %v160_v7 = vmul.f32 %v144_v61, %v96_v43  ;;  %v138_v8 = vadd.f32 1.0, %v612_v0  ;;  %v614_v13 = vpop.eup %613 }
  0x23   :  { %v153_v10 = vmul.f32 %v137_v3, %v89_v57  ;;  %v616_v15 = vpop.eup %615  ;;  %v145_v16 = vadd.f32 1.0, %v614_v13 }
  0x24   :  { %549 = vmatprep.mubr.bf16.mxu0 %v165_v2  ;;  %v169_v1 = vpack.c.bf16 %v160_v7, %v159_v62  ;;  %v154_v11 = vmul.f32 %v138_v8, %v90_v63  ;;  %v146_v17 = vadd.f32 1.0, %v616_v15 }
  0x25   :  { %v161_v5 = vmul.f32 %v145_v16, %v97_v12 }
  0x26   :  { %557 = vmatprep.mubr.bf16.mxu1 %v169_v1  ;;  %v166_v4 = vpack.c.bf16 %v154_v11, %v153_v10  ;;  %v162_v18 = vmul.f32 %v146_v17, %v98_v14 }
  0x28   :  { %v170_v19 = vpack.c.bf16 %v162_v18, %v161_v5 }
  0x2a   :  { %550 = vmatmul.mubr.bf16.gmra.mrb[4].mxu0 %v166_v4  ;;  %558 = vmatmul.mubr.bf16.gmra.mrb[4].mxu1 %v170_v19 }
  0xf5   :  { %v547_v20 = vpop.f32.mrb[0].mxu0  ;;  %v555_v24 = vpop.f32.mrb[0].mxu1 }
  0xf6   :  { %v276_v22 = vpop.f32.mrb[1].mxu0  ;;  %v285_v23 = vadd.f32 %v547_v20, %v425_v21  ;;  %v308_v28 = vpop.f32.mrb[1].mxu1  ;;  %v317_v32 = vadd.f32 %v555_v24, %v425_v21 }
  0xf7   :  { %v548_v6 = vpop.f32.mrb[2].mxu0  ;;  %v277_v27 = vadd.f32 %v425_v21, %v276_v22  ;;  %v556_v31 = vpop.f32.mrb[2].mxu1  ;;  %v309_v36 = vadd.f32 %v425_v21, %v308_v28 }
  0xf8   :  { %v288_v25 = vadd.f32 %v548_v6, %v425_v21  ;;  %v279_v26 = vpop.f32.mrb[3].mxu0  ;;  %v320_v33 = vadd.f32 %v556_v31, %v425_v21  ;;  %v311_v35 = vpop.f32.mrb[3].mxu1 }
  0xf9   :  { %v280_v29 = vadd.f32 %v425_v21, %v279_v26  ;;  %v312_v37 = vadd.f32 %v425_v21, %v311_v35 }
  0xfa   :  { %v474_v30 = vpack.c.bf16 %v288_v25, %v285_v23  ;;  %v494_v38 = vpack.c.bf16 %v320_v33, %v317_v32 }
  0xfb   :  { %v469_v34 = vpack.c.bf16 %v280_v29, %v277_v27  ;;  %v489_v39 = vpack.c.bf16 %v312_v37, %v309_v36 }
  0xfc   :  { %506 = vst [vmem:[%s833_s5 + $0x8] sm:$0xff] %v474_v30   ;;  %510 = vst [vmem:[%s833_s5 + $0x28] sm:$0xff] %v494_v38  }
  0xfd   :  { %470 = vst [vmem:[%s833_s5] sm:$0xff] %v469_v34   ;;  %v551_v40 = vpop.f32.mrb[4].mxu0  ;;  %509 = vst [vmem:[%s833_s5 + $0x20] sm:$0xff] %v489_v39   ;;  %v559_v50 = vpop.f32.mrb[4].mxu1 }
  0xfe   :  { %v292_v45 = vpop.f32.mrb[5].mxu0  ;;  %v301_v46 = vadd.f32 %v551_v40, %v425_v21  ;;  %v324_v51 = vpop.f32.mrb[5].mxu1  ;;  %v333_v54 = vadd.f32 %v559_v50, %v425_v21 }
  0xff   :  { %v552_v9 = vpop.f32.mrb[6].mxu0  ;;  %v293_v49 = vadd.f32 %v425_v21, %v292_v45  ;;  %v560_v53 = vpop.f32.mrb[6].mxu1  ;;  %v325_v56 = vadd.f32 %v425_v21, %v324_v51 }
 0x100   :  { %v304_v47 = vadd.f32 %v552_v9, %v425_v21  ;;  %v295_v48 = vpop.f32.mrb[7].mxu0  ;;  %v336_v55 = vadd.f32 %v560_v53, %v425_v21  ;;  %v327_v43 = vpop.f32.mrb[7].mxu1 }
 0x101   :  { %v296_v41 = vadd.f32 %v425_v21, %v295_v48  ;;  %v328_v58 = vadd.f32 %v425_v21, %v327_v43 }
 0x102   :  { %v484_v42 = vpack.c.bf16 %v304_v47, %v301_v46  ;;  %v504_v59 = vpack.c.bf16 %v336_v55, %v333_v54 }
 0x103   :  { %v479_v52 = vpack.c.bf16 %v296_v41, %v293_v49  ;;  %v499_v44 = vpack.c.bf16 %v328_v58, %v325_v56 }
 0x104   :  { %508 = vst [vmem:[%s833_s5 + $0x18] sm:$0xff] %v484_v42   ;;  %512 = vst [vmem:[%s833_s5 + $0x38] sm:$0xff] %v504_v59  }
 0x105   :  { %507 = vst [vmem:[%s833_s5 + $0x10] sm:$0xff] %v479_v52   ;;  %511 = vst [vmem:[%s833_s5 + $0x30] sm:$0xff] %v499_v44  }

// kernel: gcn_3l_gelu_forward.8
= control target key start
LH: loop header
LB: loop body
LE: loop exit
PB: predicated region body
PF: predicated region fallthrough
CT: control target
= control target key end

     0   :  { %vm400_vm0 = vcmask 1040384   ;;  %vm402_vm1 = vcmask 1041408   ;;  %s628_s1 = inlined_call_operand.vmem [shape: bf16[128,128], index: 1, kind: input, shape index: {}]   ;;  %s629_s0 = inlined_call_operand.vmem [shape: bf16[128,128], index: 0, kind: input, shape index: {}]   ;;  %s630_s2 = inlined_call_operand.vmem [shape: f32[128,128], index: 2, kind: output, shape index: {0}]   ;;  %s631_s3 = inlined_call_operand.vmem [shape: f32[8,128], index: 3, kind: output, shape index: {1}]  }
   0x1   :  { %v493_v0 = vld [vmem:[%s628_s1] sm:$0xff]   ;;  %v494_v1 = vld [vmem:[%s628_s1 + $0x8] sm:$0xff]   ;;  %v495_v2 = vld [vmem:[%s628_s1 + $0x10] sm:$0xff]  }
   0x2   :  { %445 = vmatprep.subr.bf16.mxu0 %v493_v0  ;;  %477 = vmatprep.subr.bf16.mxu1 %v493_v0  ;;  %v496_v3 = vld [vmem:[%s628_s1 + $0x18] sm:$0xff]   ;;  %v501_v4 = vld [vmem:[%s629_s0] sm:$0xff]   ;;  %v498_v7 = vld [vmem:[%s628_s1 + $0x28] sm:$0xff]  }
   0x3   :  { %446 = vmatpush3.bf16.msra.mxu0 %v493_v0  ;;  %485 = vmatpush3.bf16.msra.mxu1 %v493_v0  ;;  %v497_v5 = vld [vmem:[%s628_s1 + $0x20] sm:$0xff]   ;;  %v499_v8 = vld [vmem:[%s628_s1 + $0x30] sm:$0xff]   ;;  %v500_v9 = vld [vmem:[%s628_s1 + $0x38] sm:$0xff]  }
   0x4   :  { %447 = vmatprep.subr.bf16.mxu0 %v494_v1  ;;  %478 = vmatprep.subr.bf16.mxu1 %v494_v1  ;;  %v505_v6 = vld [vmem:[%s629_s0 + $0x20] sm:$0xff]   ;;  %v502_v10 = vld [vmem:[%s629_s0 + $0x8] sm:$0xff]   ;;  %v503_v12 = vld [vmem:[%s629_s0 + $0x10] sm:$0xff]  }
   0x5   :  { %461 = vmatprep.mubr.bf16.mxu0 %v501_v4  ;;  %469 = vmatprep.mubr.bf16.mxu1 %v505_v6  ;;  %v506_v11 = vld [vmem:[%s629_s0 + $0x28] sm:$0xff]   ;;  %v507_v13 = vld [vmem:[%s629_s0 + $0x30] sm:$0xff]   ;;  %v504_v14 = vld [vmem:[%s629_s0 + $0x18] sm:$0xff]  }
   0x6   :  { %v508_v15 = vld [vmem:[%s629_s0 + $0x38] sm:$0xff]  }
   0x7   :  { %448 = vmatpush3.bf16.msra.mxu0 %v494_v1  ;;  %486 = vmatpush3.bf16.msra.mxu1 %v494_v1 }
   0x8   :  { %449 = vmatprep.subr.bf16.mxu0 %v495_v2  ;;  %479 = vmatprep.subr.bf16.mxu1 %v495_v2 }
   0xb   :  { %450 = vmatpush3.bf16.msra.mxu0 %v495_v2  ;;  %487 = vmatpush3.bf16.msra.mxu1 %v495_v2 }
   0xc   :  { %451 = vmatprep.subr.bf16.mxu0 %v496_v3  ;;  %480 = vmatprep.subr.bf16.mxu1 %v496_v3 }
   0xf   :  { %452 = vmatpush3.bf16.msra.mxu0 %v496_v3  ;;  %488 = vmatpush3.bf16.msra.mxu1 %v496_v3 }
  0x10   :  { %453 = vmatprep.subr.bf16.mxu0 %v497_v5  ;;  %481 = vmatprep.subr.bf16.mxu1 %v497_v5 }
  0x13   :  { %454 = vmatpush3.bf16.msra.mxu0 %v497_v5  ;;  %489 = vmatpush3.bf16.msra.mxu1 %v497_v5 }
  0x14   :  { %455 = vmatprep.subr.bf16.mxu0 %v498_v7  ;;  %482 = vmatprep.subr.bf16.mxu1 %v498_v7 }
  0x17   :  { %456 = vmatpush3.bf16.msra.mxu0 %v498_v7  ;;  %490 = vmatpush3.bf16.msra.mxu1 %v498_v7 }
  0x18   :  { %457 = vmatprep.subr.bf16.mxu0 %v499_v8  ;;  %483 = vmatprep.subr.bf16.mxu1 %v499_v8 }
  0x1b   :  { %458 = vmatpush3.bf16.msra.mxu0 %v499_v8  ;;  %491 = vmatpush3.bf16.msra.mxu1 %v499_v8 }
  0x1c   :  { %459 = vmatprep.subr.bf16.mxu0 %v500_v9  ;;  %484 = vmatprep.subr.bf16.mxu1 %v500_v9 }
  0x1f   :  { %460 = vmatpush3.bf16.msra.mxu0 %v500_v9  ;;  %492 = vmatpush3.bf16.msra.mxu1 %v500_v9 }
  0x22   :  { %462 = vmatmul.mubr.bf16.vlgmr.msra.gmra.mrb[0].mxu0 %v502_v10  ;;  %470 = vmatmul.mubr.bf16.vlgmr.msra.gmra.mrb[0].mxu1 %v506_v11 }
  0x23   :  { %465 = vmatprep.mubr.bf16.mxu0 %v503_v12  ;;  %473 = vmatprep.mubr.bf16.mxu1 %v507_v13 }
  0x2a   :  { %466 = vmatmul.mubr.bf16.gmra.mrb[4].mxu0 %v504_v14  ;;  %474 = vmatmul.mubr.bf16.gmra.mrb[4].mxu1 %v508_v15 }
  0xf5   :  { %v463_v16 = vpop.f32.mrb[0].mxu0  ;;  %v471_v17 = vpop.f32.mrb[0].mxu1 }
  0xf6   :  { %328 = vst [vmem:[%s630_s2 + $0x10] sm:$0xff] %v463_v16  ;;  %v212_v18 = vpop.f32.mrb[1].mxu0  ;;  %336 = vst [vmem:[%s630_s2 + $0x50] sm:$0xff] %v471_v17  ;;  %v244_v19 = vpop.f32.mrb[1].mxu1  ;;  %v365_v27 = vmul.f32 %v463_v16, %v463_v16  ;;  %v373_v59 = vmul.f32 %v471_v17, %v471_v17 }
  0xf7   :  { %326 = vst [vmem:[%s630_s2] sm:$0xff] %v212_v18  ;;  %v464_v20 = vpop.f32.mrb[2].mxu0  ;;  %334 = vst [vmem:[%s630_s2 + $0x40] sm:$0xff] %v244_v19  ;;  %v472_v21 = vpop.f32.mrb[2].mxu1  ;;  %v363_v24 = vmul.f32 %v212_v18, %v212_v18  ;;  %v371_v53 = vmul.f32 %v244_v19, %v244_v19 }
  0xf8   :  { %329 = vst [vmem:[%s630_s2 + $0x18] sm:$0xff] %v464_v20  ;;  %v215_v22 = vpop.f32.mrb[3].mxu0  ;;  %337 = vst [vmem:[%s630_s2 + $0x58] sm:$0xff] %v472_v21  ;;  %v247_v23 = vpop.f32.mrb[3].mxu1  ;;  %v366_v30 = vmul.f32 %v464_v20, %v464_v20  ;;  %v374_v62 = vmul.f32 %v472_v21, %v472_v21 }
  0xf9   :  { %327 = vst [vmem:[%s630_s2 + $0x8] sm:$0xff] %v215_v22  ;;  %v342_v25 = vadd.f32 %v215_v22, %v212_v18  ;;  %v364_v26 = vmul.f32 %v215_v22, %v215_v22  ;;  %335 = vst [vmem:[%s630_s2 + $0x48] sm:$0xff] %v247_v23  ;;  %v372_v58 = vmul.f32 %v247_v23, %v247_v23 }
  0xfb   :  { %v343_v28 = vadd.f32 %v463_v16, %v342_v25  ;;  %v379_v29 = vadd.f32 %v364_v26, %v363_v24 }
  0xfd   :  { %v380_v31 = vadd.f32 %v379_v29, %v365_v27  ;;  %v467_v32 = vpop.f32.mrb[4].mxu0  ;;  %v344_v33 = vadd.f32 %v464_v20, %v343_v28  ;;  %v475_v34 = vpop.f32.mrb[4].mxu1 }
  0xfe   :  { %332 = vst [vmem:[%s630_s2 + $0x30] sm:$0xff] %v467_v32  ;;  %v228_v35 = vpop.f32.mrb[5].mxu0  ;;  %340 = vst [vmem:[%s630_s2 + $0x70] sm:$0xff] %v475_v34  ;;  %v260_v36 = vpop.f32.mrb[5].mxu1  ;;  %v369_v47 = vmul.f32 %v467_v32, %v467_v32  ;;  %v377_v7 = vmul.f32 %v475_v34, %v475_v34 }
  0xff   :  { %330 = vst [vmem:[%s630_s2 + $0x20] sm:$0xff] %v228_v35  ;;  %v345_v37 = vadd.f32 %v344_v33, %v228_v35  ;;  %v367_v38 = vmul.f32 %v228_v35, %v228_v35  ;;  %v381_v39 = vadd.f32 %v380_v31, %v366_v30  ;;  %v468_v40 = vpop.f32.mrb[6].mxu0  ;;  %338 = vst [vmem:[%s630_s2 + $0x60] sm:$0xff] %v260_v36  ;;  %v476_v41 = vpop.f32.mrb[6].mxu1 }
 0x100   :  { %333 = vst [vmem:[%s630_s2 + $0x38] sm:$0xff] %v468_v40  ;;  %v231_v42 = vpop.f32.mrb[7].mxu0  ;;  %341 = vst [vmem:[%s630_s2 + $0x78] sm:$0xff] %v476_v41  ;;  %v263_v43 = vpop.f32.mrb[7].mxu1  ;;  %v370_v50 = vmul.f32 %v468_v40, %v468_v40  ;;  %v375_v1 = vmul.f32 %v260_v36, %v260_v36  ;;  %v378_v10 = vmul.f32 %v476_v41, %v476_v41 }
 0x101   :  { %v382_v44 = vadd.f32 %v381_v39, %v367_v38  ;;  %331 = vst [vmem:[%s630_s2 + $0x28] sm:$0xff] %v231_v42  ;;  %v346_v45 = vadd.f32 %v345_v37, %v231_v42  ;;  %v368_v46 = vmul.f32 %v231_v42, %v231_v42  ;;  %339 = vst [vmem:[%s630_s2 + $0x68] sm:$0xff] %v263_v43 }
 0x102   :  { %v376_v6 = vmul.f32 %v263_v43, %v263_v43 }
 0x103   :  { %v347_v48 = vadd.f32 %v467_v32, %v346_v45  ;;  %v383_v49 = vadd.f32 %v382_v44, %v368_v46 }
 0x105   :  { %v384_v51 = vadd.f32 %v383_v49, %v369_v47  ;;  %v348_v52 = vadd.f32 %v468_v40, %v347_v48 }
 0x107   :  { %v349_v54 = vadd.f32 %v348_v52, %v244_v19  ;;  %v385_v55 = vadd.f32 %v384_v51, %v370_v50 }
 0x109   :  { %v386_v56 = vadd.f32 %v385_v55, %v371_v53  ;;  %v350_v57 = vadd.f32 %v349_v54, %v247_v23 }
 0x10b   :  { %v351_v60 = vadd.f32 %v471_v17, %v350_v57  ;;  %v387_v61 = vadd.f32 %v386_v56, %v372_v58 }
 0x10d   :  { %v388_v63 = vadd.f32 %v387_v61, %v373_v59  ;;  %v352_v0 = vadd.f32 %v472_v21, %v351_v60 }
 0x10f   :  { %v353_v2 = vadd.f32 %v352_v0, %v260_v36  ;;  %v389_v3 = vadd.f32 %v388_v63, %v374_v62 }
 0x111   :  { %v390_v4 = vadd.f32 %v389_v3, %v375_v1  ;;  %v354_v5 = vadd.f32 %v353_v2, %v263_v43 }
 0x113   :  { %v355_v8 = vadd.f32 %v475_v34, %v354_v5  ;;  %v391_v9 = vadd.f32 %v390_v4, %v376_v6 }
 0x115   :  { %v356_v11 = vadd.f32 %v476_v41, %v355_v8  ;;  %v392_v12 = vadd.f32 %v391_v9, %v377_v7 }
 0x117   :  { %v357_v13 = vrot.slane %v356_v11, 4  ;;  %v393_v14 = vadd.f32 %v392_v12, %v378_v10 }
 0x119   :  { %v358_v15 = vadd.f32 %v357_v13, %v356_v11  ;;  %v394_v16 = vrot.slane %v393_v14, 4 }
 0x11b   :  { %v359_v17 = vrot.slane %v358_v15, 2  ;;  %v395_v18 = vadd.f32 %v394_v16, %v393_v14 }
 0x11d   :  { %v360_v19 = vadd.f32 %v359_v17, %v358_v15  ;;  %v396_v20 = vrot.slane %v395_v18, 2 }
 0x11f   :  { %v361_v21 = vrot.slane %v360_v19, 1  ;;  %v397_v22 = vadd.f32 %v396_v20, %v395_v18 }
 0x121   :  { %v398_v23 = vrot.slane %v397_v22, 1  ;;  %v362_v24 = vadd.f32 %v361_v21, %v360_v19 }
 0x123   :  { %v399_v25 = vadd.f32 %v398_v23, %v397_v22 }
 0x125   :  { %v401_v26 = vsel %vm400_vm0, %v362_v24, %v399_v25 }
 0x126   :  { %v403_v27 = vsel %vm402_vm1, %v401_v26, 0.0 }
 0x127   :  { %404 = vst [vmem:[%s631_s3] sm:$0xff] %v403_v27 }

// kernel: gcn_3l_gelu_forward.13
= control target key start
LH: loop header
LB: loop body
LE: loop exit
PB: predicated region body
PF: predicated region fallthrough
CT: control target
= control target key end

     0   :  { %s709_s3 = inlined_call_operand.vmem [shape: bf16[128,128], index: 3, kind: input, shape index: {}]   ;;  %s710_s0 = inlined_call_operand.vmem [shape: f32[128,128], index: 0, kind: input, shape index: {}]   ;;  %s711_s1 = inlined_call_operand.vmem [shape: f32[1,128], index: 1, kind: input, shape index: {}]   ;;  %s712_s2 = inlined_call_operand.vmem [shape: f32[1,128], index: 2, kind: input, shape index: {}]   ;;  %s713_s4 = inlined_call_operand.vmem [shape: f32[1,128], index: 4, kind: input, shape index: {}]   ;;  %s714_s5 = inlined_call_operand.vmem [shape: f32[128,128], index: 5, kind: output, shape index: {}]  }
   0x1   :  { %v434_v0 = vld [vmem:[%s709_s3] sm:$0xff]   ;;  %v435_v1 = vld [vmem:[%s709_s3 + $0x8] sm:$0xff]   ;;  %v436_v2 = vld [vmem:[%s709_s3 + $0x10] sm:$0xff]  }
   0x2   :  { %386 = vmatprep.subr.bf16.mxu0 %v434_v0  ;;  %418 = vmatprep.subr.bf16.mxu1 %v434_v0  ;;  %v437_v3 = vld [vmem:[%s709_s3 + $0x18] sm:$0xff]   ;;  %v21_v4 = vld [vmem:[%s710_s0] sm:$0xff]  ;;  %v22_v5 = vld [vmem:[%s710_s0 + $0x8] sm:$0xff] }
   0x3   :  { %387 = vmatpush3.bf16.msra.mxu0 %v434_v0  ;;  %426 = vmatpush3.bf16.msra.mxu1 %v434_v0  ;;  %v525_v6 = vld [vmem:[%s711_s1] ss:$0 sm:$0xff]  ;;  %v30_v11 = vld [vmem:[%s710_s0 + $0x48] sm:$0xff]  ;;  %v23_v14 = vld [vmem:[%s710_s0 + $0x10] sm:$0xff] }
   0x4   :  { %388 = vmatprep.subr.bf16.mxu0 %v435_v1  ;;  %419 = vmatprep.subr.bf16.mxu1 %v435_v1  ;;  %v44_v7 = vmul.f32 %v525_v6, %v21_v4  ;;  %v45_v8 = vmul.f32 %v525_v6, %v22_v5  ;;  %v532_v9 = vld [vmem:[%s712_s2] ss:$0 sm:$0xff]  ;;  %v53_v13 = vmul.f32 %v525_v6, %v30_v11  ;;  %v24_v15 = vld [vmem:[%s710_s0 + $0x18] sm:$0xff]  ;;  %v31_v23 = vld [vmem:[%s710_s0 + $0x50] sm:$0xff] }
   0x5   :  { %v29_v10 = vld [vmem:[%s710_s0 + $0x40] sm:$0xff]  ;;  %v46_v18 = vmul.f32 %v525_v6, %v23_v14  ;;  %v47_v22 = vmul.f32 %v525_v6, %v24_v15  ;;  %v32_v24 = vld [vmem:[%s710_s0 + $0x58] sm:$0xff]  ;;  %v26_v28 = vld [vmem:[%s710_s0 + $0x28] sm:$0xff]  ;;  %v54_v33 = vmul.f32 %v525_v6, %v31_v23 }
   0x6   :  { %v52_v12 = vmul.f32 %v525_v6, %v29_v10  ;;  %v67_v16 = vadd.f32 %v532_v9, %v44_v7  ;;  %v68_v17 = vadd.f32 %v532_v9, %v45_v8  ;;  %v438_v19 = vld [vmem:[%s709_s3 + $0x20] sm:$0xff]   ;;  %v76_v21 = vadd.f32 %v532_v9, %v53_v13  ;;  %v439_v34 = vld [vmem:[%s709_s3 + $0x28] sm:$0xff]   ;;  %v440_v47 = vld [vmem:[%s709_s3 + $0x30] sm:$0xff]  }
   0x7   :  { %389 = vmatpush3.bf16.msra.mxu0 %v435_v1  ;;  %427 = vmatpush3.bf16.msra.mxu1 %v435_v1  ;;  %v25_v27 = vld [vmem:[%s710_s0 + $0x20] sm:$0xff]  ;;  %v570_v31 = vadd.f32 %v532_v9, %v46_v18  ;;  %v573_v32 = vadd.f32 %v532_v9, %v47_v22  ;;  %v55_v35 = vmul.f32 %v525_v6, %v32_v24  ;;  %v34_v45 = vld [vmem:[%s710_s0 + $0x68] sm:$0xff]  ;;  %v27_v49 = vld [vmem:[%s710_s0 + $0x30] sm:$0xff] }
   0x8   :  { %390 = vmatprep.subr.bf16.mxu0 %v436_v2  ;;  %420 = vmatprep.subr.bf16.mxu1 %v436_v2  ;;  %v75_v20 = vadd.f32 %v532_v9, %v52_v12  ;;  %v99_v25 = vmul.f32 0.70710677, %v67_v16  ;;  %v100_v26 = vmul.f32 0.70710677, %v68_v17  ;;  %v108_v30 = vmul.f32 0.70710677, %v76_v21 }
   0x9   :  { %v48_v36 = vmul.f32 %v525_v6, %v25_v27  ;;  %v49_v37 = vmul.f32 %v525_v6, %v26_v28  ;;  %v33_v38 = vld [vmem:[%s710_s0 + $0x60] sm:$0xff]  ;;  %v101_v39 = vmul.f32 0.70710677, %v570_v31  ;;  %v102_v40 = vmul.f32 0.70710677, %v573_v32  ;;  %v28_v50 = vld [vmem:[%s710_s0 + $0x38] sm:$0xff] }
   0xa   :  { %v107_v29 = vmul.f32 0.70710677, %v75_v20  ;;  %442 = verf.f32 %v99_v25  ;;  %v588_v41 = vadd.f32 %v532_v9, %v54_v33  ;;  %v591_v42 = vadd.f32 %v532_v9, %v55_v35  ;;  %v35_v58 = vld [vmem:[%s710_s0 + $0x70] sm:$0xff]  ;;  %v36_v62 = vld [vmem:[%s710_s0 + $0x78] sm:$0xff] }
   0xb   :  { %391 = vmatpush3.bf16.msra.mxu0 %v436_v2  ;;  %428 = vmatpush3.bf16.msra.mxu1 %v436_v2  ;;  %444 = verf.f32 %v100_v26  ;;  %v594_v43 = vadd.f32 %v532_v9, %v48_v36  ;;  %v597_v44 = vadd.f32 %v532_v9, %v49_v37  ;;  %v56_v46 = vmul.f32 %v525_v6, %v33_v38  ;;  %v441_v63 = vld [vmem:[%s709_s3 + $0x38] sm:$0xff]  }
   0xc   :  { %392 = vmatprep.subr.bf16.mxu0 %v437_v3  ;;  %421 = vmatprep.subr.bf16.mxu1 %v437_v3  ;;  %446 = verf.f32 %v107_v29  ;;  %v109_v48 = vmul.f32 0.70710677, %v588_v41  ;;  %v83_v51 = vmul.f32 0.5, %v67_v16  ;;  %v84_v52 = vmul.f32 0.5, %v68_v17 }
   0xd   :  { %448 = verf.f32 %v108_v30  ;;  %v110_v53 = vmul.f32 0.70710677, %v591_v42  ;;  %v103_v54 = vmul.f32 0.70710677, %v594_v43  ;;  %v104_v55 = vmul.f32 0.70710677, %v597_v44 }
   0xe   :  { %450 = verf.f32 %v101_v39  ;;  %v57_v56 = vmul.f32 %v525_v6, %v34_v45  ;;  %v618_v57 = vadd.f32 %v532_v9, %v56_v46  ;;  %v91_v59 = vmul.f32 0.5, %v75_v20 }
   0xf   :  { %393 = vmatpush3.bf16.msra.mxu0 %v437_v3  ;;  %429 = vmatpush3.bf16.msra.mxu1 %v437_v3  ;;  %452 = verf.f32 %v102_v40  ;;  %v50_v60 = vmul.f32 %v525_v6, %v27_v49  ;;  %v51_v61 = vmul.f32 %v525_v6, %v28_v50  ;;  %v92_v0 = vmul.f32 0.5, %v76_v21 }
  0x10   :  { %394 = vmatprep.subr.bf16.mxu0 %v438_v19  ;;  %422 = vmatprep.subr.bf16.mxu1 %v438_v19  ;;  %454 = verf.f32 %v109_v48  ;;  %v632_v1 = vadd.f32 %v532_v9, %v57_v56  ;;  %v111_v2 = vmul.f32 0.70710677, %v618_v57  ;;  %v58_v7 = vmul.f32 %v525_v6, %v35_v58 }
  0x11   :  { %456 = verf.f32 %v110_v53  ;;  %v636_v4 = vadd.f32 %v532_v9, %v50_v60  ;;  %v639_v5 = vadd.f32 %v532_v9, %v51_v61  ;;  %v59_v12 = vmul.f32 %v525_v6, %v36_v62 }
  0x12   :  { %458 = verf.f32 %v103_v54  ;;  %v112_v11 = vmul.f32 0.70710677, %v632_v1  ;;  %v85_v15 = vmul.f32 0.5, %v570_v31  ;;  %v86_v16 = vmul.f32 0.5, %v573_v32 }
  0x13   :  { %395 = vmatpush3.bf16.msra.mxu0 %v438_v19  ;;  %430 = vmatpush3.bf16.msra.mxu1 %v438_v19  ;;  %460 = verf.f32 %v104_v55  ;;  %v105_v17 = vmul.f32 0.70710677, %v636_v4  ;;  %v106_v21 = vmul.f32 0.70710677, %v639_v5  ;;  %v81_v24 = vadd.f32 %v532_v9, %v58_v7 }
  0x14   :  { %396 = vmatprep.subr.bf16.mxu0 %v439_v34  ;;  %423 = vmatprep.subr.bf16.mxu1 %v439_v34  ;;  %v443_v3 = vpop.eup %442  ;;  %462 = verf.f32 %v111_v2  ;;  %v82_v28 = vadd.f32 %v532_v9, %v59_v12  ;;  %v93_v32 = vmul.f32 0.5, %v588_v41  ;;  %v94_v35 = vmul.f32 0.5, %v591_v42 }
  0x15   :  { %v445_v8 = vpop.eup %444  ;;  %v131_v10 = vadd.f32 1.0, %v443_v3  ;;  %464 = verf.f32 %v112_v11  ;;  %v113_v36 = vmul.f32 0.70710677, %v81_v24  ;;  %v87_v9 = vmul.f32 0.5, %v594_v43 }
  0x16   :  { %v447_v13 = vpop.eup %446  ;;  %v132_v14 = vadd.f32 1.0, %v445_v8  ;;  %466 = verf.f32 %v105_v17  ;;  %v114_v37 = vmul.f32 0.70710677, %v82_v28  ;;  %v88_v48 = vmul.f32 0.5, %v597_v44 }
  0x17   :  { %397 = vmatpush3.bf16.msra.mxu0 %v439_v34  ;;  %431 = vmatpush3.bf16.msra.mxu1 %v439_v34  ;;  %v449_v18 = vpop.eup %448  ;;  %v147_v19 = vmul.f32 %v131_v10, %v83_v51  ;;  %v139_v20 = vadd.f32 1.0, %v447_v13  ;;  %468 = verf.f32 %v106_v21  ;;  %v95_v49 = vmul.f32 0.5, %v618_v57 }
  0x18   :  { %398 = vmatprep.subr.bf16.mxu0 %v440_v47  ;;  %424 = vmatprep.subr.bf16.mxu1 %v440_v47  ;;  %v451_v22 = vpop.eup %450  ;;  %v148_v6 = vmul.f32 %v132_v14, %v84_v52  ;;  %v140_v23 = vadd.f32 1.0, %v449_v18  ;;  %470 = verf.f32 %v113_v36  ;;  %v96_v43 = vmul.f32 0.5, %v632_v1 }
  0x19   :  { %v453_v25 = vpop.eup %452  ;;  %v155_v26 = vmul.f32 %v139_v20, %v91_v59  ;;  %v133_v27 = vadd.f32 1.0, %v451_v22  ;;  %472 = verf.f32 %v114_v37  ;;  %v89_v57 = vmul.f32 0.5, %v636_v4  ;;  %v361_v20 = vld [vmem:[%s713_s4] ss:$0 sm:$0xff] }
  0x1a   :  { %v163_v29 = vpack.c.bf16 %v148_v6, %v147_v19  ;;  %v156_v30 = vmul.f32 %v140_v23, %v92_v0  ;;  %v134_v31 = vadd.f32 1.0, %v453_v25  ;;  %v455_v33 = vpop.eup %454  ;;  %v97_v12 = vmul.f32 0.5, %v81_v24 }
  0x1b   :  { %399 = vmatpush3.bf16.msra.mxu0 %v440_v47  ;;  %432 = vmatpush3.bf16.msra.mxu1 %v440_v47  ;;  %v149_v34 = vmul.f32 %v133_v27, %v85_v15  ;;  %v457_v38 = vpop.eup %456  ;;  %v141_v45 = vadd.f32 1.0, %v455_v33  ;;  %v98_v14 = vmul.f32 0.5, %v82_v28 }
  0x1c   :  { %400 = vmatprep.subr.bf16.mxu0 %v441_v63  ;;  %425 = vmatprep.subr.bf16.mxu1 %v441_v63  ;;  %v167_v39 = vpack.c.bf16 %v156_v30, %v155_v26  ;;  %v150_v40 = vmul.f32 %v134_v31, %v86_v16  ;;  %v459_v46 = vpop.eup %458  ;;  %v142_v47 = vadd.f32 1.0, %v457_v38 }
  0x1d   :  { %402 = vmatprep.mubr.bf16.mxu0 %v163_v29  ;;  %v461_v41 = vpop.eup %460  ;;  %v157_v42 = vmul.f32 %v141_v45, %v93_v32  ;;  %v135_v51 = vadd.f32 1.0, %v459_v46 }
  0x1e   :  { %410 = vmatprep.mubr.bf16.mxu1 %v167_v39  ;;  %v164_v50 = vpack.c.bf16 %v150_v40, %v149_v34  ;;  %v463_v52 = vpop.eup %462  ;;  %v158_v53 = vmul.f32 %v142_v47, %v94_v35  ;;  %v136_v54 = vadd.f32 1.0, %v461_v41 }
  0x1f   :  { %401 = vmatpush3.bf16.msra.mxu0 %v441_v63  ;;  %433 = vmatpush3.bf16.msra.mxu1 %v441_v63  ;;  %v151_v55 = vmul.f32 %v135_v51, %v87_v9  ;;  %v143_v56 = vadd.f32 1.0, %v463_v52  ;;  %v465_v58 = vpop.eup %464  ;;  %v90_v63 = vmul.f32 0.5, %v639_v5 }
  0x20   :  { %v168_v59 = vpack.c.bf16 %v158_v53, %v157_v42  ;;  %v152_v44 = vmul.f32 %v136_v54, %v88_v48  ;;  %v467_v60 = vpop.eup %466  ;;  %v144_v61 = vadd.f32 1.0, %v465_v58 }
  0x21   :  { %v159_v62 = vmul.f32 %v143_v56, %v95_v49  ;;  %v469_v0 = vpop.eup %468  ;;  %v137_v3 = vadd.f32 1.0, %v467_v60 }
  0x22   :  { %403 = vmatmul.mubr.bf16.vlgmr.msra.gmra.mrb[0].mxu0 %v164_v50  ;;  %411 = vmatmul.mubr.bf16.vlgmr.msra.gmra.mrb[0].mxu1 %v168_v59  ;;  %v165_v2 = vpack.c.bf16 %v152_v44, %v151_v55  ;;  %v160_v7 = vmul.f32 %v144_v61, %v96_v43  ;;  %v138_v8 = vadd.f32 1.0, %v469_v0  ;;  %v471_v13 = vpop.eup %470 }
  0x23   :  { %v153_v10 = vmul.f32 %v137_v3, %v89_v57  ;;  %v473_v15 = vpop.eup %472  ;;  %v145_v16 = vadd.f32 1.0, %v471_v13 }
  0x24   :  { %406 = vmatprep.mubr.bf16.mxu0 %v165_v2  ;;  %v169_v1 = vpack.c.bf16 %v160_v7, %v159_v62  ;;  %v154_v11 = vmul.f32 %v138_v8, %v90_v63  ;;  %v146_v17 = vadd.f32 1.0, %v473_v15 }
  0x25   :  { %v161_v5 = vmul.f32 %v145_v16, %v97_v12 }
  0x26   :  { %414 = vmatprep.mubr.bf16.mxu1 %v169_v1  ;;  %v166_v4 = vpack.c.bf16 %v154_v11, %v153_v10  ;;  %v162_v18 = vmul.f32 %v146_v17, %v98_v14 }
  0x28   :  { %v170_v19 = vpack.c.bf16 %v162_v18, %v161_v5 }
  0x2a   :  { %407 = vmatmul.mubr.bf16.gmra.mrb[4].mxu0 %v166_v4  ;;  %415 = vmatmul.mubr.bf16.gmra.mrb[4].mxu1 %v170_v19 }
  0xf5   :  { %v404_v21 = vpop.f32.mrb[0].mxu0  ;;  %v412_v25 = vpop.f32.mrb[0].mxu1 }
  0xf6   :  { %v285_v22 = vadd.f32 %v404_v21, %v361_v20  ;;  %v276_v6 = vpop.f32.mrb[1].mxu0  ;;  %v317_v28 = vadd.f32 %v412_v25, %v361_v20  ;;  %v308_v29 = vpop.f32.mrb[1].mxu1 }
  0xf7   :  { %v277_v23 = vadd.f32 %v361_v20, %v276_v6  ;;  %v405_v24 = vpop.f32.mrb[2].mxu0  ;;  %v309_v31 = vadd.f32 %v361_v20, %v308_v29  ;;  %v413_v32 = vpop.f32.mrb[2].mxu1 }
  0xf8   :  { %341 = vst [vmem:[%s714_s5 + $0x10] sm:$0xff] %v285_v22  ;;  %v288_v26 = vadd.f32 %v405_v24, %v361_v20  ;;  %v279_v27 = vpop.f32.mrb[3].mxu0  ;;  %349 = vst [vmem:[%s714_s5 + $0x50] sm:$0xff] %v317_v28  ;;  %v320_v33 = vadd.f32 %v413_v32, %v361_v20  ;;  %v311_v34 = vpop.f32.mrb[3].mxu1 }
  0xf9   :  { %339 = vst [vmem:[%s714_s5] sm:$0xff] %v277_v23  ;;  %v280_v30 = vadd.f32 %v361_v20, %v279_v27  ;;  %347 = vst [vmem:[%s714_s5 + $0x40] sm:$0xff] %v309_v31  ;;  %v312_v35 = vadd.f32 %v361_v20, %v311_v34 }
  0xfa   :  { %342 = vst [vmem:[%s714_s5 + $0x18] sm:$0xff] %v288_v26  ;;  %350 = vst [vmem:[%s714_s5 + $0x58] sm:$0xff] %v320_v33 }
  0xfb   :  { %340 = vst [vmem:[%s714_s5 + $0x8] sm:$0xff] %v280_v30  ;;  %348 = vst [vmem:[%s714_s5 + $0x48] sm:$0xff] %v312_v35 }
  0xfd   :  { %v408_v36 = vpop.f32.mrb[4].mxu0  ;;  %v416_v47 = vpop.f32.mrb[4].mxu1 }
  0xfe   :  { %v301_v37 = vadd.f32 %v408_v36, %v361_v20  ;;  %v292_v38 = vpop.f32.mrb[5].mxu0  ;;  %v333_v48 = vadd.f32 %v416_v47, %v361_v20  ;;  %v324_v49 = vpop.f32.mrb[5].mxu1 }
  0xff   :  { %v293_v39 = vadd.f32 %v361_v20, %v292_v38  ;;  %v409_v40 = vpop.f32.mrb[6].mxu0  ;;  %v325_v41 = vadd.f32 %v361_v20, %v324_v49  ;;  %v417_v50 = vpop.f32.mrb[6].mxu1 }
 0x100   :  { %345 = vst [vmem:[%s714_s5 + $0x30] sm:$0xff] %v301_v37  ;;  %v304_v45 = vadd.f32 %v409_v40, %v361_v20  ;;  %v295_v9 = vpop.f32.mrb[7].mxu0  ;;  %353 = vst [vmem:[%s714_s5 + $0x70] sm:$0xff] %v333_v48  ;;  %v336_v42 = vadd.f32 %v417_v50, %v361_v20  ;;  %v327_v51 = vpop.f32.mrb[7].mxu1 }
 0x101   :  { %343 = vst [vmem:[%s714_s5 + $0x20] sm:$0xff] %v293_v39  ;;  %v296_v46 = vadd.f32 %v361_v20, %v295_v9  ;;  %351 = vst [vmem:[%s714_s5 + $0x60] sm:$0xff] %v325_v41  ;;  %v328_v52 = vadd.f32 %v361_v20, %v327_v51 }
 0x102   :  { %346 = vst [vmem:[%s714_s5 + $0x38] sm:$0xff] %v304_v45  ;;  %354 = vst [vmem:[%s714_s5 + $0x78] sm:$0xff] %v336_v42 }
 0x103   :  { %344 = vst [vmem:[%s714_s5 + $0x28] sm:$0xff] %v296_v46  ;;  %352 = vst [vmem:[%s714_s5 + $0x68] sm:$0xff] %v328_v52 }

</bundles_post_ra>
